<compile_context>
chip_gen: v5e
topology: v5e:2x2
jax: 0.10.0
libtpu: 0.0.40
codegen_flags: <defaults>
</compile_context>

<pallas_src>
import jax
import jax.numpy as jnp
from jax.experimental import pallas as pl
from jax.experimental.pallas import tpu as pltpu


def _critic_head_kernel(s_ref, a_ref, w_in_ref, w_hs_ref, w_ha_ref, bias_ref,
                        q1_ref, q2_ref):
    """Computes one Q head per grid step (grid axis = head index)."""
    head = pl.program_id(0)
    h2 = w_hs_ref.shape[-1]

    # In-kernel low-precision casts: hidden under the (dominant) weight DMA.
    s = s_ref[...].astype(jnp.bfloat16)       # [B, state_dim]
    a = a_ref[...].astype(jnp.bfloat16)       # [B, action_dim]

    bias = bias_ref[...]                      # [5, H1] f32 (packed small tensors)
    b_in = bias[0:1, :]                       # layer_1/4 bias              [1, H1]
    b_hid = bias[1:2, :h2]                    # layer_2_a/5_a bias          [1, H2]
    w_out = bias[2:3, :h2]                    # layer_3/6 weight row (f32)  [1, H2]
    scale = bias[3:4, :h2]                    # int8 per-channel scales     [1, H2]
    b_out = bias[4:5, 0:1]                    # layer_3/6 bias              [1, 1]

    # layer_1 / layer_4 : relu(s @ W + b)   (bf16 x bf16 -> f32 acc on MXU)
    hin = jnp.dot(s, w_in_ref[...], preferred_element_type=jnp.float32) + b_in
    hin = jnp.maximum(hin, 0.0)

    # layer_2_s/5_s : int8 weights, dequantized in-kernel.  int8 -> bf16 is
    # exact; the per-output-channel scale is applied to the f32 accumulator.
    w_hs = w_hs_ref[...].astype(jnp.float32).astype(jnp.bfloat16)
    hs = jnp.dot(hin.astype(jnp.bfloat16), w_hs,
                 preferred_element_type=jnp.float32) * scale
    # layer_2_a/5_a (bias added below, per the PyTorch forward)
    ha = jnp.dot(a, w_ha_ref[...], preferred_element_type=jnp.float32)
    h = jnp.maximum(hs + ha + b_hid, 0.0)     # [B, H2] f32

    # layer_3 / layer_6 : N=1 projection on the VPU/XLU in f32
    # (avoids a near-empty 1-column MXU pass).
    q = jnp.sum(h * w_out, axis=-1, keepdims=True) + b_out

    # Each output block is resident across the head axis; write once.
    @pl.when(head == 0)
    def _():
        q1_ref[...] = q

    @pl.when(head == 1)
    def _():
        q2_ref[...] = q


def critic_forward(s, a, packed):
    """s: [B, state_dim] f32, a: [B, action_dim] f32 -> (q1, q2), each [B, 1] f32."""
    w_in, w_hs_q, w_ha, bias_pack = packed
    B, S = s.shape
    A = a.shape[1]
    h1 = w_in.shape[-1]
    h2 = w_hs_q.shape[-1]

    q1, q2 = pl.pallas_call(
        _critic_head_kernel,
        out_shape=(jax.ShapeDtypeStruct((B, 1), jnp.float32),
                   jax.ShapeDtypeStruct((B, 1), jnp.float32)),
        grid=(2,),
        in_specs=[
            pl.BlockSpec((B, S), lambda h: (0, 0)),             # s  (f32, resident)
            pl.BlockSpec((B, A), lambda h: (0, 0)),             # a  (f32, resident)
            pl.BlockSpec((None, S, h1), lambda h: (h, 0, 0)),   # W1 / W4        (bf16)
            pl.BlockSpec((None, h1, h2), lambda h: (h, 0, 0)),  # W2s / W5s      (int8)
            pl.BlockSpec((None, A, h2), lambda h: (h, 0, 0)),   # W2a / W5a      (bf16)
            pl.BlockSpec((None, 5, h1), lambda h: (h, 0, 0)),   # packed biases/scales (f32)
        ],
        out_specs=(pl.BlockSpec((B, 1), lambda h: (0, 0)),
                   pl.BlockSpec((B, 1), lambda h: (0, 0))),
        compiler_params=pltpu.CompilerParams(
            # Output blocks are revisited across the head axis -> "arbitrary".
            dimension_semantics=("arbitrary",),
        ),
    )(s, a, w_in, w_hs_q, w_ha, bias_pack)
    return q1, q2


def make_raw_params(key, state_dim, action_dim, h1=800, h2=600):
    """PyTorch-Linear-style params (weights pre-transposed to [in, out]), f32."""
    ks = jax.random.split(key, 16)

    def lin(kw, kb, fan_in, fan_out):
        bound = 1.0 / (fan_in ** 0.5)
        w = jax.random.uniform(kw, (fan_in, fan_out), jnp.float32, -bound, bound)
        b = jax.random.uniform(kb, (fan_out,), jnp.float32, -bound, bound)
        return w, b

    p = {}
    p["w1"], p["b1"] = lin(ks[0], ks[1], state_dim, h1)
    p["w2s"], p["b2s"] = lin(ks[2], ks[3], h1, h2)        # b2s unused in forward
    p["w2a"], p["b2a"] = lin(ks[4], ks[5], action_dim, h2)
    p["w3"], p["b3"] = lin(ks[6], ks[7], h2, 1)
    p["w4"], p["b4"] = lin(ks[8], ks[9], state_dim, h1)
    p["w5s"], p["b5s"] = lin(ks[10], ks[11], h1, h2)      # b5s unused in forward
    p["w5a"], p["b5a"] = lin(ks[12], ks[13], action_dim, h2)
    p["w6"], p["b6"] = lin(ks[14], ks[15], h2, 1)
    return p


def _quantize_per_channel(w):
    """w: [K, N] f32 -> (int8 [K, N], f32 scale [N]) with per-output-channel scale."""
    maxabs = jnp.max(jnp.abs(w), axis=0)
    scale = jnp.maximum(maxabs, 1e-8) / 127.0
    q = jnp.clip(jnp.round(w / scale), -127.0, 127.0).astype(jnp.int8)
    return q, scale


def pack_params(p):
    """Stack the two Q heads on a leading axis of 2; bf16 for the small matrices,
    int8 + per-channel scales for the dominant 800x600 ones."""
    h1 = p["w1"].shape[1]
    h2 = p["w2s"].shape[1]
    assert h2 <= h1, "packed-bias layout assumes hidden2 <= hidden1"

    w_in = jnp.stack([p["w1"], p["w4"]]).astype(jnp.bfloat16)      # [2, S, 800]
    w_ha = jnp.stack([p["w2a"], p["w5a"]]).astype(jnp.bfloat16)    # [2, A, 600]

    q2s, sc2 = _quantize_per_channel(p["w2s"])
    q5s, sc5 = _quantize_per_channel(p["w5s"])
    w_hs_q = jnp.stack([q2s, q5s])                                 # [2, 800, 600] int8

    def rows(b_in, b_hid, w_out, sc, b_out):
        r = jnp.zeros((5, h1), jnp.float32)
        r = r.at[0, :].set(b_in)           # layer_1/4 bias (800)
        r = r.at[1, :h2].set(b_hid)        # layer_2_a/5_a bias (600)
        r = r.at[2, :h2].set(w_out[:, 0])  # layer_3/6 weight row (600, kept f32)
        r = r.at[3, :h2].set(sc)           # int8 per-channel scales (600)
        r = r.at[4, 0].set(b_out[0])       # layer_3/6 bias (scalar)
        return r

    bias_pack = jnp.stack([
        rows(p["b1"], p["b2a"], p["w3"], sc2, p["b3"]),
        rows(p["b4"], p["b5a"], p["w6"], sc5, p["b6"]),
    ])                                                             # [2, 5, 800]
    return w_in, w_hs_q, w_ha, bias_pack


def _reference_f32(s, a, p):
    """Exact f32 forward matching the PyTorch module semantics."""
    relu = lambda x: jnp.maximum(x, 0.0)
    s1 = relu(s @ p["w1"] + p["b1"])
    h1 = relu(s1 @ p["w2s"] + a @ p["w2a"] + p["b2a"])
    q1 = h1 @ p["w3"] + p["b3"]
    s2 = relu(s @ p["w4"] + p["b4"])
    h2 = relu(s2 @ p["w5s"] + a @ p["w5a"] + p["b5a"])
    q2 = h2 @ p["w6"] + p["b6"]
    return q1, q2


def _reference_matched(s, a, packed):
    """Reference that mirrors the kernel's bf16/int8 rounding exactly."""
    w_in, w_hs_q, w_ha, bias = packed
    h2 = w_hs_q.shape[-1]
    s_b = s.astype(jnp.bfloat16)
    a_b = a.astype(jnp.bfloat16)

    qs = []
    for h in range(2):
        b_in = bias[h, 0:1, :]
        b_hid = bias[h, 1:2, :h2]
        w_out = bias[h, 2:3, :h2]
        scale = bias[h, 3:4, :h2]
        b_out = bias[h, 4, 0]
        hin = jnp.maximum(
            jnp.dot(s_b, w_in[h], preferred_element_type=jnp.float32) + b_in, 0.0)
        w_hs = w_hs_q[h].astype(jnp.float32).astype(jnp.bfloat16)
        hs = jnp.dot(hin.astype(jnp.bfloat16), w_hs,
                     preferred_element_type=jnp.float32) * scale
        ha = jnp.dot(a_b, w_ha[h], preferred_element_type=jnp.float32)
        hh = jnp.maximum(hs + ha + b_hid, 0.0)
        qs.append(jnp.sum(hh * w_out, axis=-1, keepdims=True) + b_out)
    return qs[0], qs[1]


if __name__ == "__main__":
    key = jax.random.PRNGKey(0)
    k_s, k_a, k_p = jax.random.split(key, 3)

    batch = 2
    state_dim = 24   # typical velodyne laser-state dim
    action_dim = 2

    s = jax.random.normal(k_s, (batch, state_dim), jnp.float32)
    a = jax.random.uniform(k_a, (batch, action_dim), jnp.float32,
                           minval=-1.0, maxval=1.0)

    raw = make_raw_params(k_p, state_dim, action_dim)
    packed = pack_params(raw)

    q1, q2 = jax.block_until_ready(critic_forward(s, a, packed))
    assert q1.shape == (batch, 1) and q2.shape == (batch, 1)

    # Tight check against a reference applying the same bf16/int8 rounding.
    r1, r2 = _reference_matched(s, a, packed)
    assert jnp.allclose(q1, r1, atol=2e-3, rtol=2e-3)
    assert jnp.allclose(q2, r2, atol=2e-3, rtol=2e-3)

    # Loose sanity check against the exact f32 PyTorch semantics
    # (difference is only the bf16/int8 weight & activation storage).
    f1, f2 = _reference_f32(s, a, raw)
    assert jnp.allclose(q1, f1, atol=5e-2, rtol=5e-2)
    assert jnp.allclose(q2, f2, atol=5e-2, rtol=5e-2)

    print("KERNEL_OK")
</pallas_src>

<mosaic_0001>
module attributes {stable_mosaic.version = 11 : i64} {
  func.func @_critic_head_kernel(%arg0: i32, %arg1: memref<2x24xf32, #tpu.memory_space<vmem>>, %arg2: memref<2x2xf32, #tpu.memory_space<vmem>>, %arg3: memref<1x24x800xbf16, #tpu.memory_space<vmem>>, %arg4: memref<1x800x600xi8, #tpu.memory_space<vmem>>, %arg5: memref<1x2x600xbf16, #tpu.memory_space<vmem>>, %arg6: memref<1x5x800xf32, #tpu.memory_space<vmem>>, %arg7: memref<2x1xf32, #tpu.memory_space<vmem>>, %arg8: memref<2x1xf32, #tpu.memory_space<vmem>>) attributes {dimension_semantics = [#tpu.dimension_semantics<arbitrary>], iteration_bounds = array<i64: 2>, scalar_prefetch = 0 : i64, scratch_operands = 0 : i64, tpu.core_type = #tpu.core_type<tc>, window_params = [{pipeline_mode = #tpu.pipeline_mode<synchronous>, transform_indices = @transform_0, window_bounds = array<i64: 2, 24>}, {pipeline_mode = #tpu.pipeline_mode<synchronous>, transform_indices = @transform_1, window_bounds = array<i64: 2, 2>}, {transform_indices = @transform_2, window_bounds = array<i64: 1, 24, 800>}, {transform_indices = @transform_3, window_bounds = array<i64: 1, 800, 600>}, {transform_indices = @transform_4, window_bounds = array<i64: 1, 2, 600>}, {transform_indices = @transform_5, window_bounds = array<i64: 1, 5, 800>}, {pipeline_mode = #tpu.pipeline_mode<synchronous>, transform_indices = @transform_6, window_bounds = array<i64: 2, 1>}, {pipeline_mode = #tpu.pipeline_mode<synchronous>, transform_indices = @transform_7, window_bounds = array<i64: 2, 1>}]} {
    %c0 = arith.constant 0 : index
    %c0_0 = arith.constant 0 : index
    %0 = vector.load %arg1[%c0, %c0_0] : memref<2x24xf32, #tpu.memory_space<vmem>>, vector<2x24xf32>
    %1 = arith.truncf %0 : vector<2x24xf32> to vector<2x24xbf16>
    %c0_1 = arith.constant 0 : index
    %c0_2 = arith.constant 0 : index
    %2 = vector.load %arg2[%c0_1, %c0_2] : memref<2x2xf32, #tpu.memory_space<vmem>>, vector<2x2xf32>
    %3 = arith.truncf %2 : vector<2x2xf32> to vector<2x2xbf16>
    %c0_3 = arith.constant 0 : index
    %c0_4 = arith.constant 0 : index
    %c0_5 = arith.constant 0 : index
    %4 = vector.load %arg6[%c0_3, %c0_4, %c0_5] : memref<1x5x800xf32, #tpu.memory_space<vmem>>, vector<1x5x800xf32>
    %5 = vector.shape_cast %4 : vector<1x5x800xf32> to vector<5x800xf32>
    %6 = vector.extract_strided_slice %5 {offsets = [0, 0], sizes = [1, 800], strides = [1, 1]} : vector<5x800xf32> to vector<1x800xf32>
    %7 = vector.extract_strided_slice %5 {offsets = [1, 0], sizes = [1, 600], strides = [1, 1]} : vector<5x800xf32> to vector<1x600xf32>
    %8 = vector.extract_strided_slice %5 {offsets = [2, 0], sizes = [1, 600], strides = [1, 1]} : vector<5x800xf32> to vector<1x600xf32>
    %9 = vector.extract_strided_slice %5 {offsets = [3, 0], sizes = [1, 600], strides = [1, 1]} : vector<5x800xf32> to vector<1x600xf32>
    %10 = vector.extract_strided_slice %5 {offsets = [4, 0], sizes = [1, 1], strides = [1, 1]} : vector<5x800xf32> to vector<1x1xf32>
    %c0_6 = arith.constant 0 : index
    %c0_7 = arith.constant 0 : index
    %c0_8 = arith.constant 0 : index
    %11 = vector.load %arg3[%c0_6, %c0_7, %c0_8] : memref<1x24x800xbf16, #tpu.memory_space<vmem>>, vector<1x24x800xbf16>
    %12 = vector.shape_cast %11 : vector<1x24x800xbf16> to vector<24x800xbf16>
    %cst = arith.constant dense<0.000000e+00> : vector<2x800xf32>
    %13 = tpu.matmul %1, %12, %cst {dimension_numbers = #tpu.dot_dimension_numbers<[1], [0], [0], [1], [0, 0, 1, 1], [], []>} : vector<2x24xbf16>, vector<24x800xbf16>, vector<2x800xf32> -> vector<2x800xf32>
    %14 = vector.broadcast %6 : vector<1x800xf32> to vector<2x800xf32>
    %15 = arith.addf %13, %14 : vector<2x800xf32>
    %cst_9 = arith.constant 0.000000e+00 : f32
    %16 = vector.broadcast %cst_9 : f32 to vector<2x800xf32>
    %17 = arith.maximumf %15, %16 : vector<2x800xf32>
    %c0_10 = arith.constant 0 : index
    %c0_11 = arith.constant 0 : index
    %c0_12 = arith.constant 0 : index
    %18 = vector.load %arg4[%c0_10, %c0_11, %c0_12] : memref<1x800x600xi8, #tpu.memory_space<vmem>>, vector<1x800x600xi8>
    %19 = vector.shape_cast %18 : vector<1x800x600xi8> to vector<800x600xi8>
    %20 = arith.sitofp %19 : vector<800x600xi8> to vector<800x600xf32>
    %21 = arith.truncf %20 : vector<800x600xf32> to vector<800x600xbf16>
    %22 = arith.truncf %17 : vector<2x800xf32> to vector<2x800xbf16>
    %cst_13 = arith.constant dense<0.000000e+00> : vector<2x600xf32>
    %23 = tpu.matmul %22, %21, %cst_13 {dimension_numbers = #tpu.dot_dimension_numbers<[1], [0], [0], [1], [0, 0, 1, 1], [], []>} : vector<2x800xbf16>, vector<800x600xbf16>, vector<2x600xf32> -> vector<2x600xf32>
    %24 = vector.broadcast %9 : vector<1x600xf32> to vector<2x600xf32>
    %25 = arith.mulf %23, %24 : vector<2x600xf32>
    %c0_14 = arith.constant 0 : index
    %c0_15 = arith.constant 0 : index
    %c0_16 = arith.constant 0 : index
    %26 = vector.load %arg5[%c0_14, %c0_15, %c0_16] : memref<1x2x600xbf16, #tpu.memory_space<vmem>>, vector<1x2x600xbf16>
    %27 = vector.shape_cast %26 : vector<1x2x600xbf16> to vector<2x600xbf16>
    %cst_17 = arith.constant dense<0.000000e+00> : vector<2x600xf32>
    %28 = tpu.matmul %3, %27, %cst_17 {dimension_numbers = #tpu.dot_dimension_numbers<[1], [0], [0], [1], [0, 0, 1, 1], [], []>} : vector<2x2xbf16>, vector<2x600xbf16>, vector<2x600xf32> -> vector<2x600xf32>
    %29 = arith.addf %25, %28 : vector<2x600xf32>
    %30 = vector.broadcast %7 : vector<1x600xf32> to vector<2x600xf32>
    %31 = arith.addf %29, %30 : vector<2x600xf32>
    %cst_18 = arith.constant 0.000000e+00 : f32
    %32 = vector.broadcast %cst_18 : f32 to vector<2x600xf32>
    %33 = arith.maximumf %31, %32 : vector<2x600xf32>
    %34 = vector.broadcast %8 : vector<1x600xf32> to vector<2x600xf32>
    %35 = arith.mulf %33, %34 : vector<2x600xf32>
    %cst_19 = arith.constant dense<0.000000e+00> : vector<2xf32>
    %36 = vector.multi_reduction <add>, %35, %cst_19 [1] : vector<2x600xf32> to vector<2xf32>
    %37 = vector.shape_cast %36 : vector<2xf32> to vector<2x1xf32>
    %38 = vector.broadcast %10 : vector<1x1xf32> to vector<2x1xf32>
    %39 = arith.addf %37, %38 : vector<2x1xf32>
    %c0_i32 = arith.constant 0 : i32
    %40 = arith.cmpi eq, %arg0, %c0_i32 : i32
    %41 = arith.extui %40 : i1 to i32
    %c0_i32_20 = arith.constant 0 : i32
    %42 = arith.cmpi ne, %41, %c0_i32_20 : i32
    scf.if %42 {
      %c0_22 = arith.constant 0 : index
      %c0_23 = arith.constant 0 : index
      %46 = vector.load %arg7[%c0_22, %c0_23] : memref<2x1xf32, #tpu.memory_space<vmem>>, vector<2x1xf32>
      tpu.vector_store %arg7[%c0_22, %c0_23], %39 {strides = array<i32>} : memref<2x1xf32, #tpu.memory_space<vmem>>, vector<2x1xf32>,
    } else {
    }
    %c1_i32 = arith.constant 1 : i32
    %43 = arith.cmpi eq, %arg0, %c1_i32 : i32
    %44 = arith.extui %43 : i1 to i32
    %c0_i32_21 = arith.constant 0 : i32
    %45 = arith.cmpi ne, %44, %c0_i32_21 : i32
    scf.if %45 {
      %c0_22 = arith.constant 0 : index
      %c0_23 = arith.constant 0 : index
      %46 = vector.load %arg8[%c0_22, %c0_23] : memref<2x1xf32, #tpu.memory_space<vmem>>, vector<2x1xf32>
      tpu.vector_store %arg8[%c0_22, %c0_23], %39 {strides = array<i32>} : memref<2x1xf32, #tpu.memory_space<vmem>>, vector<2x1xf32>,
    } else {
    }
    return
  }
  func.func @transform_0(%arg0: i32) -> (i32, i32) {
    %c0_i32 = arith.constant 0 : i32
    %c0_i32_0 = arith.constant 0 : i32
    %c0_i32_1 = arith.constant 0 : i32
    return %c0_i32, %c0_i32_0 : i32, i32
  }
  func.func @transform_1(%arg0: i32) -> (i32, i32) {
    %c0_i32 = arith.constant 0 : i32
    %c0_i32_0 = arith.constant 0 : i32
    %c0_i32_1 = arith.constant 0 : i32
    return %c0_i32, %c0_i32_0 : i32, i32
  }
  func.func @transform_2(%arg0: i32) -> (i32, i32, i32) {
    %c0_i32 = arith.constant 0 : i32
    %c0_i32_0 = arith.constant 0 : i32
    %c0_i32_1 = arith.constant 0 : i32
    return %arg0, %c0_i32, %c0_i32_0 : i32, i32, i32
  }
  func.func @transform_3(%arg0: i32) -> (i32, i32, i32) {
    %c0_i32 = arith.constant 0 : i32
    %c0_i32_0 = arith.constant 0 : i32
    %c0_i32_1 = arith.constant 0 : i32
    return %arg0, %c0_i32, %c0_i32_0 : i32, i32, i32
  }
  func.func @transform_4(%arg0: i32) -> (i32, i32, i32) {
    %c0_i32 = arith.constant 0 : i32
    %c0_i32_0 = arith.constant 0 : i32
    %c0_i32_1 = arith.constant 0 : i32
    return %arg0, %c0_i32, %c0_i32_0 : i32, i32, i32
  }
  func.func @transform_5(%arg0: i32) -> (i32, i32, i32) {
    %c0_i32 = arith.constant 0 : i32
    %c0_i32_0 = arith.constant 0 : i32
    %c0_i32_1 = arith.constant 0 : i32
    return %arg0, %c0_i32, %c0_i32_0 : i32, i32, i32
  }
  func.func @transform_6(%arg0: i32) -> (i32, i32) {
    %c0_i32 = arith.constant 0 : i32
    %c0_i32_0 = arith.constant 0 : i32
    %c0_i32_1 = arith.constant 0 : i32
    return %c0_i32, %c0_i32_0 : i32, i32
  }
  func.func @transform_7(%arg0: i32) -> (i32, i32) {
    %c0_i32 = arith.constant 0 : i32
    %c0_i32_0 = arith.constant 0 : i32
    %c0_i32_1 = arith.constant 0 : i32
    return %c0_i32, %c0_i32_0 : i32, i32
  }
}

</mosaic_0001>

<bundles_post_ra>
// kernel: tpu_custom_call.1
= control target key start
LH: loop header
LB: loop body
LE: loop exit
PB: predicated region body
PF: predicated region fallthrough
CT: control target
= control target key end

     0   :  { %13 = vsyncpa [#allocation3], 0  ;;  %s3734_s0 = inlined_call_operand.vmem [shape: f32[2,24], index: 0, kind: input, shape index: {}]   ;;  %s3735_s1 = inlined_call_operand.vmem [shape: f32[2,2], index: 1, kind: input, shape index: {}]   ;;  %s3736_s2 = inlined_call_operand.vmem [shape: bf16[2,24,800], index: 2, kind: input, shape index: {}]   ;;  %s3737_s3 = inlined_call_operand.hbm [shape: s8[2,800,600], index: 3, kind: input, shape index: {}]   ;;  %s3738_s4 = inlined_call_operand.vmem [shape: bf16[2,2,600], index: 4, kind: input, shape index: {}]   ;;  %s3739_s5 = inlined_call_operand.vmem [shape: f32[2,5,800], index: 5, kind: input, shape index: {}]   ;;  %s3740_s6 = inlined_call_operand.vmem [shape: f32[2,1], index: 6, kind: output, shape index: {0}]   ;;  %s3741_s7 = inlined_call_operand.vmem [shape: f32[2,1], index: 7, kind: output, shape index: {1}]  }
   0x1   :  { %15 = vsyncpa [#allocation3 + $0x1], 0  ;;  %s2850_s24 = smov 0   ;;  %s2852_s25 = smov 0  }
   0x2   :  { %s2854_s26 = smov 0   ;;  %s2856_s27 = smov 0  }
   0x3 LB: > { %s2869_s28 = sadd.s32 4294967295, %s2806_s27   ;;  %s2872_s29 = sadd.s32 1, %s2806_s27   ;;  %s2806_s27 = sphi %s2856_s27, %s3773_s27   ;;  %s2802_s26 = sphi %s2854_s26, %s3772_s26   ;;  %s2798_s25 = sphi %s2852_s25, %s3771_s25   ;;  %s2794_s24 = sphi %s2850_s24, %s3770_s24  }
   0x4   : > { %s93_s30 = ssub.s32 %s2806_s27, %s2872_s29  ;;  %s96_s8 = sadd.s32 1, %s2802_s26 }
   0x5   : > { %p94_p0 = scmp.eq.s32.totalorder %s93_s30, 0  ;;  %p103_p1 = scmp.ne.s32.totalorder %s2802_s26, %s2798_s25 }
   0x6   : > { %p104_p2 = scmp.eq.s32.totalorder %s2806_s27, 0  ;;  %p109_p3 = scmp.ne.s32.totalorder %s2798_s25, %s2794_s24 }
   0x7   : > { %s2882_s9 = scalar_select %p94_p0, %s2802_s26, %s96_s8  }
   0x8   : > { %p105_p4 = por %p104_p2, %p103_p1  ;;  %p110_p5 = scmp.eq.s32.totalorder %s2869_s28, 0 }
   0x9   : > { %p2702_p6 = scmp.lt.s32.totalorder %s2806_s27, 2  ;;  %s241_s11 = sand.u32 1, %s2802_s26  }
   0xa   : > { %p2886_p7 = por %p110_p5, %p109_p3  ;;  %s2690_s12 = smul.u32 1000, %s241_s11 }
   0xb   : > { %s2691_s13 = smul.u32 1000, %s2806_s27  ;;  %p2892_p8 = pnand %p2702_p6, %p105_p4 }
   0xc   : > { %s245_s18 = scalar_lea.vmem [#allocation2], %s2690_s12  ;;  %p2631_p9 = scmp.ge.s32.totalorder %s2806_s27, 1 }
   0xd   : > { %s250_s17 = scalar_lea.hbm %s3737_s3, %s2691_s13  ;;  %s253_s19 = sshll.u32 %s245_s18, 4  ;;  %s254_s19 = int_to_ptr.vmem [resolvable:$true] %s253_s19 }
   0xe   : > { %s251_s20 = sshll.u32 %s250_s17, 4  ;;  %s242_s21 = scalar_lea.sflag [#allocation3], %s241_s11  ;;  %s252_s20 = int_to_ptr.hbm [resolvable:$true] %s251_s20 }
   0xf   : > { %s2742_s22 = sshra.s32 %s252_s20, 4  ;;  %p2746_p11 = pneg %p2892_p8  ;;  %s2743_s22 = int_to_ptr.hbm [resolvable:$true] %s2742_s22 }
  0x10   : > { %s2744_s23 = scalar_lea.hbm %s2743_s22, 1000  ;;  %s2749_s8 = scalar_lea.hbm %s3737_s3, 2000 }
  0x11   : > { %p2745_p10 = scmp.ne.s32.totalorder %s2743_s22, %s2744_s23  ;;  %p2750_p0 = scmp.lt.s32.totalorder %s2743_s22, %s3737_s3 }
  0x12   : > { %p2751_p1 = scmp.lt.s32.totalorder %s2749_s8, %s2744_s23 }
  0x13   : > { %p2747_p12 = pnand %p2746_p11, %p2745_p10 }
  0x14   : > { %p2752_p2 = por %p2751_p1, %p2750_p0 }
  0x15   : > { %p2748_p13 = pneg %p2747_p12 }
  0x17   : > { %p2753_p3 = pnand %p2752_p2, %p2748_p13 }
  0x19   : > { %2756 = shalt.err (!%p2753_p3)
}
  0x1a   : > { %s2808_s11 = smov 640   ;;  %s2809_s15 = smov 40  }
  0x1b   : > { %2701 = dma.hbm_to_vmem [thread:$0]  (!%p2892_p8), %s252_s20, 16000, %s254_s19, %s242_s21, %s2808_s11, %s2808_s11, %s2809_s15  }
  0x1c   : > { %p276_p4 = scmp.lt.s32.totalorder %s2806_s27, 3 }
  0x1e   : > { %p277_p5 = pnand %p2631_p9, %p276_p4 }
  0x20   : > { %280 = sbr.rel (%p277_p5) target bundleno = 727 (0x2d7), region = 44 }
  0x25   : > { %s282_s16 = sand.u32 1, %s2798_s25  }
  0x26   : > { %s2692_s17 = smul.u32 1000, %s282_s16  ;;  %s283_s18 = scalar_lea.sflag [#allocation3], %s282_s16 }
  0x28   : > { %s2914_s22 = scalar_lea.vmem [#allocation2], %s2692_s17 }
  0x29   : > { %2789 = dma.done.wait (%p2886_p7), %s283_s18, 16000  }
  0x2a   : > { %2791 = vsyncadd (%p2886_p7), %s283_s18, 4294951296  ;;  %p327_p6 = scmp.lt.s32.totalorder %s2869_s28, 1  ;;  %vm430_vm0 = vcmask 1043456   ;;  %v342_v19 = vld [vmem:[%s3734_s0] sm:$0x3]  ;;  %vm426_vm1 = vcmask 195584  }
  0x2b   : > { %v2958_v33 = vpack.c.bf16 %v342_v19, %v342_v19  ;;  %v565_v43 = vld [vmem:[%s2914_s22 + $0x78] sm:$0xff]  ;;  %v560_v58 = vld [vmem:[%s2914_s22 + $0x50] sm:$0xff]  ;;  %vm1932_vm2 = vcmask 261120   ;;  %vm2413_vm3 = vcmask 1040384   ;;  %vm2409_vm4 = vcmask 15360   ;;  %p2679_p7 = scmp.ne.s32.totalorder %s2869_s28, 0 }
  0x2c   : > { %s2922_s14 = scalar_select %p327_p6, %s2869_s28, 1  ;;  %v585_v44 = vld [vmem:[%s2914_s22 + $0x118] sm:$0xff]  ;;  %v745_v48 = vunpack.c.2.s8 %v565_v43  ;;  %v750_v49 = vunpack.c.3.s8 %v565_v43  ;;  %v735_v52 = vunpack.c.0.s8 %v565_v43  ;;  %v740_v57 = vunpack.c.1.s8 %v565_v43 }
  0x2d   : > { %v825_v50 = vunpack.c.2.s8 %v585_v44  ;;  %v830_v51 = vunpack.c.3.s8 %v585_v44  ;;  %v625_v53 = vld [vmem:[%s2914_s22 + $0x258] sm:$0xff]  ;;  %vm2519_vm5 = vcmask 1041408   ;;  %vm2527_vm6 = vcmask 713728  }
  0x2e   : > { %s2693_s27 = smul.u32 84, %s2922_s14  ;;  %v1245_v56 = vcvt.s32.f32 %v745_v48  ;;  %v1250_v59 = vcvt.s32.f32 %v750_v49  ;;  %v1235_v62 = vcvt.s32.f32 %v735_v52  ;;  %v1240_v63 = vcvt.s32.f32 %v740_v57 }
  0x2f   : > { %v1325_v60 = vcvt.s32.f32 %v825_v50  ;;  %v1330_v61 = vcvt.s32.f32 %v830_v51  ;;  %v980_v19 = vunpack.c.1.s8 %v625_v53  ;;  %s2695_s24 = smul.u32 56, %s2922_s14 }
  0x30   : > { %s2928_s21 = scalar_lea.vmem %s3736_s2, %s2693_s27  ;;  %s2694_s12 = smul.u32 5, %s2922_s14 }
  0x31   : > { %v361_v0 = vld [vmem:[%s2928_s21 + $0x38] sm:$0xff]  ;;  %v362_v1 = vld [vmem:[%s2928_s21 + $0x40] sm:$0xff]  ;;  %v2644_v11 = vld [vmem:[%s2928_s21 + $0x8] sm:$0xf]  ;;  %s3019_s13 = scalar_lea.vmem %s3739_s5, %s2695_s24 }
  0x32   : > { %v2636_v2 = vld [vmem:[%s2928_s21] sm:$0xf]  ;;  %v398_v3 = vunpack.c.l.b16 %v361_v0  ;;  %v399_v4 = vunpack.c.h.b16 %v361_v0  ;;  %v400_v5 = vunpack.c.l.b16 %v362_v1  ;;  %v401_v6 = vunpack.c.h.b16 %v362_v1  ;;  %v2686_v7 = vld [vmem:[%s2928_s21 + $0x18] sm:$0xf0]  ;;  %v2683_v8 = vld [vmem:[%s2928_s21 + $0x4] sm:$0xf]  ;;  %s335_s16 = scalar_lea.vmem %s3738_s4, %s2694_s12 }
  0x33   : > { %v2638_v9 = vld [vmem:[%s2928_s21 + $0x1c] sm:$0xf0]  ;;  %v2637_v10 = vor.u32 %v2686_v7, %v2636_v2  ;;  %v2687_v12 = vld [vmem:[%s2928_s21 + $0x20] sm:$0xf0]  ;;  %v2684_v13 = vld [vmem:[%s2928_s21 + $0xc] sm:$0xf]  ;;  %v815_v0 = vunpack.c.0.s8 %v585_v44  ;;  %v820_v1 = vunpack.c.1.s8 %v585_v44  ;;  %v985_v2 = vunpack.c.2.s8 %v625_v53 }
  0x34   : > { %v412_v14 = vpack.c.b16 %v398_v3, %v398_v3  ;;  %v413_v15 = vpack.c.b16 %v399_v4, %v399_v4  ;;  %v414_v16 = vpack.c.b16 %v400_v5, %v400_v5  ;;  %v415_v17 = vpack.c.b16 %v401_v6, %v401_v6  ;;  %v2646_v18 = vld [vmem:[%s2928_s21 + $0x24] sm:$0xf0]  ;;  %v364_v25 = vld [vmem:[%s2928_s21 + $0x50] sm:$0xf]  ;;  %v2949_v27 = vld [vmem:[%s2928_s21 + $0x28] sm:$0xf0] }
  0x35   : > { %v363_v20 = vld [vmem:[%s2928_s21 + $0x48] sm:$0xff]  ;;  %v2641_v21 = vor.u32 %v2683_v8, %v2638_v9  ;;  %v2645_v22 = vor.u32 %v2687_v12, %v2644_v11  ;;  %v2649_v23 = vor.u32 %v2684_v13, %v2646_v18  ;;  %v2946_v26 = vld [vmem:[%s2928_s21 + $0x10] sm:$0xf]  ;;  %v2956_v32 = vld [vmem:[%s2928_s21 + $0x14] sm:$0xf]  ;;  %v404_v36 = vunpack.c.l.b16 %v364_v25 }
  0x36   : > { %v402_v24 = vunpack.c.l.b16 %v363_v20  ;;  %v432_v28 = vsel %vm430_vm0, %v412_v14, 0  ;;  %v435_v29 = vsel %vm430_vm0, %v413_v15, 0  ;;  %v438_v30 = vsel %vm430_vm0, %v414_v16, 0  ;;  %v2654_v37 = vld [vmem:[%s2928_s21 + $0x2c] sm:$0xf0]  ;;  %v580_v3 = vld [vmem:[%s2914_s22 + $0xf0] sm:$0xff] }
  0x37   : > { %v441_v31 = vsel %vm430_vm0, %v415_v17, 0  ;;  %458 = vmatpush.bf16.msra.mxu0 %v432_v28  ;;  %471 = vmatpush.bf16.msra.mxu1 %v435_v29  ;;  %v403_v35 = vunpack.c.h.b16 %v363_v20  ;;  %v2962_v38 = vld [vmem:[%s2928_s21 + $0x18] sm:$0xf]  ;;  %v2965_v39 = vld [vmem:[%s2928_s21 + $0x30] sm:$0xf0]  ;;  %v2653_v40 = vor.u32 %v2949_v27, %v2946_v26  ;;  %v2657_v41 = vor.u32 %v2956_v32, %v2654_v37 }
  0x38   : > { %v416_v34 = vpack.c.b16 %v402_v24, %v402_v24  ;;  %484 = vmatpush.bf16.msra.mxu2 %v438_v30  ;;  %497 = vmatpush.bf16.msra.mxu3 %v441_v31  ;;  %v2661_v42 = vor.u32 %v2965_v39, %v2962_v38  ;;  %v418_v47 = vpack.c.b16 %v404_v36, %v404_v36  ;;  %v990_v6 = vunpack.c.3.s8 %v625_v53  ;;  %v620_v24 = vld [vmem:[%s2914_s22 + $0x230] sm:$0xff]  ;;  %v555_v29 = vld [vmem:[%s2914_s22 + $0x28] sm:$0xff] }
  0x39   : > { %v417_v46 = vpack.c.b16 %v403_v35, %v403_v35  ;;  %v1710_v4 = vpack.c.bf16 %v1250_v59, %v1245_v56  ;;  %v1750_v5 = vpack.c.bf16 %v1330_v61, %v1325_v60  ;;  %v725_v7 = vunpack.c.2.s8 %v560_v58  ;;  %v575_v35 = vld [vmem:[%s2914_s22 + $0xc8] sm:$0xff] }
  0x3a   : > { %v444_v45 = vsel %vm430_vm0, %v416_v34, 0  ;;  %v450_v55 = vsel %vm430_vm0, %v418_v47, 0  ;;  %v1705_v8 = vpack.c.bf16 %v1240_v63, %v1235_v62  ;;  %v1315_v9 = vcvt.s32.f32 %v815_v0  ;;  %v615_v60 = vld [vmem:[%s2914_s22 + $0x208] sm:$0xff] }
  0x3b   : > { %459 = vmatpush.bf16.msra.mxu0 %v2637_v10  ;;  %472 = vmatpush.bf16.msra.mxu1 %v2641_v21  ;;  %v447_v54 = vsel %vm430_vm0, %v417_v46, 0  ;;  %v1320_v10 = vcvt.s32.f32 %v820_v1  ;;  %v1485_v11 = vcvt.s32.f32 %v985_v2  ;;  %v1490_v12 = vcvt.s32.f32 %v990_v6  ;;  %v550_v1 = vld [vmem:[%s2914_s22] sm:$0xff] }
  0x3c   : > { %485 = vmatpush.bf16.msra.mxu2 %v2645_v22  ;;  %498 = vmatpush.bf16.msra.mxu3 %v2649_v23  ;;  %v730_v13 = vunpack.c.3.s8 %v560_v58  ;;  %v1225_v14 = vcvt.s32.f32 %v725_v7  ;;  %v805_v15 = vunpack.c.2.s8 %v580_v3  ;;  %v810_v17 = vunpack.c.3.s8 %v580_v3  ;;  %v570_v6 = vld [vmem:[%s2914_s22 + $0xa0] sm:$0xff] }
  0x3d   : > { %v1745_v16 = vpack.c.bf16 %v1320_v10, %v1315_v9  ;;  %v975_v18 = vunpack.c.0.s8 %v625_v53  ;;  %v1830_v20 = vpack.c.bf16 %v1490_v12, %v1485_v11  ;;  %v715_v23 = vunpack.c.0.s8 %v560_v58 }
  0x3e   : > { %2662 = vmatmul.msk.bf16.vlgmr.msra.gmra.mxu0 %vm426_vm1, %v2958_v33  ;;  %2663 = vmatmul.msk.bf16.vlgmr.msra.gmra.mxu1 %vm426_vm1, %v2958_v33  ;;  %v1230_v21 = vcvt.s32.f32 %v730_v13  ;;  %v1305_v22 = vcvt.s32.f32 %v805_v15  ;;  %v1310_v25 = vcvt.s32.f32 %v810_v17  ;;  %v1480_v27 = vcvt.s32.f32 %v980_v19 }
  0x3f   : > { %510 = vmatpush.bf16.msrb.mxu0 %v444_v45  ;;  %523 = vmatpush.bf16.msrb.mxu1 %v447_v54  ;;  %v1475_v26 = vcvt.s32.f32 %v975_v18  ;;  %v720_v28 = vunpack.c.1.s8 %v560_v58  ;;  %v1215_v31 = vcvt.s32.f32 %v715_v23  ;;  %v795_v32 = vunpack.c.0.s8 %v580_v3 }
  0x40   : > { %2664 = vmatmul.msk.bf16.vlgmr.msra.gmra.mxu2 %vm426_vm1, %v2958_v33  ;;  %2665 = vmatmul.msk.bf16.vlgmr.msra.gmra.mxu3 %vm426_vm1, %v2958_v33  ;;  %v1700_v30 = vpack.c.bf16 %v1230_v21, %v1225_v14  ;;  %v800_v34 = vunpack.c.1.s8 %v580_v3  ;;  %v1740_v36 = vpack.c.bf16 %v1310_v25, %v1305_v22  ;;  %v970_v45 = vunpack.c.3.s8 %v620_v24 }
  0x41   : > { %536 = vmatpush.bf16.msrb.mxu2 %v450_v55  ;;  %1936 = vmatpush.bf16.msrb.mxu3 %v1710_v4  ;;  %v1825_v37 = vpack.c.bf16 %v1480_v27, %v1475_v26  ;;  %v1295_v43 = vcvt.s32.f32 %v795_v32  ;;  %v705_v46 = vunpack.c.2.s8 %v555_v29  ;;  %v710_v38 = vunpack.c.3.s8 %v555_v29  ;;  %v645_v27 = vld [vmem:[%s2914_s22 + $0x2f8] sm:$0xff] }
  0x42   : > { %v1300_v44 = vcvt.s32.f32 %v800_v34  ;;  %v785_v39 = vunpack.c.2.s8 %v575_v35  ;;  %v1470_v49 = vcvt.s32.f32 %v970_v45  ;;  %v790_v51 = vunpack.c.3.s8 %v575_v35 }
  0x43   : > { %511 = vmatpush.bf16.msrb.mxu0 %v2653_v40  ;;  %524 = vmatpush.bf16.msrb.mxu1 %v2657_v41  ;;  %v1220_v40 = vcvt.s32.f32 %v720_v28  ;;  %v965_v41 = vunpack.c.2.s8 %v620_v24  ;;  %v1205_v50 = vcvt.s32.f32 %v705_v46  ;;  %v1210_v52 = vcvt.s32.f32 %v710_v38  ;;  %v610_v38 = vld [vmem:[%s2914_s22 + $0x1e0] sm:$0xff] }
  0x44   : > { %v1285_v53 = vcvt.s32.f32 %v785_v39  ;;  %v955_v54 = vunpack.c.0.s8 %v620_v24  ;;  %v960_v55 = vunpack.c.1.s8 %v620_v24  ;;  %v1290_v57 = vcvt.s32.f32 %v790_v51 }
  0x45   : > { %537 = vmatpush.bf16.msrb.mxu2 %v2661_v42  ;;  %1937 = vmatpush.bf16.msrb.mxu3 %v1705_v8  ;;  %v1695_v47 = vpack.c.bf16 %v1220_v40, %v1215_v31  ;;  %v1465_v48 = vcvt.s32.f32 %v965_v41  ;;  %v1735_v42 = vpack.c.bf16 %v1300_v44, %v1295_v43  ;;  %v695_v58 = vunpack.c.0.s8 %v555_v29  ;;  %v665_v31 = vld [vmem:[%s2914_s22 + $0x398] sm:$0xff] }
  0x46   : > { %v700_v59 = vunpack.c.1.s8 %v555_v29  ;;  %v1690_v61 = vpack.c.bf16 %v1210_v52, %v1205_v50  ;;  %v1455_v62 = vcvt.s32.f32 %v955_v54  ;;  %v1460_v63 = vcvt.s32.f32 %v960_v55  ;;  %v605_v44 = vld [vmem:[%s2914_s22 + $0x1b8] sm:$0xff] }
  0x47   : > { %1949 = vmatpush.bf16.msra.mxu0 %v1750_v5  ;;  %v1820_v56 = vpack.c.bf16 %v1470_v49, %v1465_v48  ;;  %v775_v0 = vunpack.c.0.s8 %v575_v35  ;;  %v1730_v2 = vpack.c.bf16 %v1290_v57, %v1285_v53  ;;  %v1195_v3 = vcvt.s32.f32 %v695_v58 }
  0x48   : > { %v1200_v4 = vcvt.s32.f32 %v700_v59  ;;  %v780_v5 = vunpack.c.1.s8 %v575_v35  ;;  %v1815_v7 = vpack.c.bf16 %v1460_v63, %v1455_v62  ;;  %v945_v9 = vunpack.c.2.s8 %v615_v60 }
  0x49   : > { %1975 = vmatpush.bf16.msra.mxu2 %v1830_v20  ;;  %1938 = vmatpush.bf16.msrb.mxu3 %v1700_v30  ;;  %v1275_v8 = vcvt.s32.f32 %v775_v0  ;;  %v950_v10 = vunpack.c.3.s8 %v615_v60  ;;  %v685_v13 = vunpack.c.2.s8 %v550_v1  ;;  %v690_v14 = vunpack.c.3.s8 %v550_v1 }
  0x4a   : > { %v1685_v11 = vpack.c.bf16 %v1200_v4, %v1195_v3  ;;  %v1280_v12 = vcvt.s32.f32 %v780_v5  ;;  %v1445_v15 = vcvt.s32.f32 %v945_v9  ;;  %v765_v17 = vunpack.c.2.s8 %v570_v6 }
  0x4b   : > { %1950 = vmatpush.bf16.msra.mxu0 %v1745_v16  ;;  %v1450_v16 = vcvt.s32.f32 %v950_v10  ;;  %v770_v18 = vunpack.c.3.s8 %v570_v6  ;;  %v1185_v20 = vcvt.s32.f32 %v685_v13  ;;  %v1190_v21 = vcvt.s32.f32 %v690_v14 }
  0x4c   : > { %v1725_v19 = vpack.c.bf16 %v1280_v12, %v1275_v8  ;;  %v935_v22 = vunpack.c.0.s8 %v615_v60  ;;  %v1265_v24 = vcvt.s32.f32 %v765_v17  ;;  %v940_v26 = vunpack.c.1.s8 %v615_v60  ;;  %v640_v12 = vld [vmem:[%s2914_s22 + $0x2d0] sm:$0xff] }
  0x4d   : > { %1976 = vmatpush.bf16.msra.mxu2 %v1825_v37  ;;  %1939 = vmatpush.bf16.msrb.mxu3 %v1695_v47  ;;  %v1810_v23 = vpack.c.bf16 %v1450_v16, %v1445_v15  ;;  %v1270_v25 = vcvt.s32.f32 %v770_v18  ;;  %v675_v29 = vunpack.c.0.s8 %v550_v1  ;;  %v680_v30 = vunpack.c.1.s8 %v550_v1 }
  0x4e   : > { %2666 = vmatmul.msk.bf16.vlgmr.msrb.gmra.mxu0 %vm426_vm1, %v2958_v33  ;;  %2667 = vmatmul.msk.bf16.vlgmr.msrb.gmra.mxu1 %vm426_vm1, %v2958_v33  ;;  %v1435_v28 = vcvt.s32.f32 %v935_v22  ;;  %v1440_v34 = vcvt.s32.f32 %v940_v26  ;;  %v755_v35 = vunpack.c.0.s8 %v570_v6  ;;  %v1065_v41 = vunpack.c.2.s8 %v645_v27  ;;  %v600_v26 = vld [vmem:[%s2914_s22 + $0x190] sm:$0xff] }
  0x4f   : > { %1951 = vmatpush.bf16.msra.mxu0 %v1740_v36  ;;  %v1720_v32 = vpack.c.bf16 %v1270_v25, %v1265_v24  ;;  %v760_v36 = vunpack.c.1.s8 %v570_v6  ;;  %v1175_v37 = vcvt.s32.f32 %v675_v29  ;;  %v1180_v40 = vcvt.s32.f32 %v680_v30 }
  0x50   : > { %2668 = vmatmul.msk.bf16.vlgmr.msrb.gmra.mxu2 %vm426_vm1, %v2958_v33  ;;  %v1680_v33 = vpack.c.bf16 %v1190_v21, %v1185_v20  ;;  %v1070_v43 = vunpack.c.3.s8 %v645_v27  ;;  %v1805_v45 = vpack.c.bf16 %v1440_v34, %v1435_v28  ;;  %v1255_v46 = vcvt.s32.f32 %v755_v35  ;;  %v660_v21 = vld [vmem:[%s2914_s22 + $0x370] sm:$0xff] }
  0x51   : > { %1977 = vmatpush.bf16.msra.mxu2 %v1820_v56  ;;  %1940 = vmatpush.bf16.msrb.mxu3 %v1690_v61  ;;  %v1260_v47 = vcvt.s32.f32 %v760_v36  ;;  %v1145_v48 = vunpack.c.2.s8 %v665_v31  ;;  %v1675_v39 = vpack.c.bf16 %v1180_v40, %v1175_v37  ;;  %v1150_v50 = vunpack.c.3.s8 %v665_v31 }
  0x52   : > { %v1570_v49 = vcvt.s32.f32 %v1070_v43  ;;  %v905_v53 = vunpack.c.2.s8 %v605_v44  ;;  %v910_v54 = vunpack.c.3.s8 %v605_v44  ;;  %v925_v57 = vunpack.c.2.s8 %v610_v38 }
  0x53   : > { %1952 = vmatpush.bf16.msra.mxu0 %v1735_v42  ;;  %v1565_v42 = vcvt.s32.f32 %v1065_v41  ;;  %v1715_v51 = vpack.c.bf16 %v1260_v47, %v1255_v46  ;;  %v1645_v52 = vcvt.s32.f32 %v1145_v48  ;;  %v1650_v56 = vcvt.s32.f32 %v1150_v50 }
  0x54   : > { %v930_v58 = vunpack.c.3.s8 %v610_v38  ;;  %v1405_v59 = vcvt.s32.f32 %v905_v53  ;;  %v1410_v60 = vcvt.s32.f32 %v910_v54  ;;  %v1055_v61 = vunpack.c.0.s8 %v645_v27 }
  0x55   : > { %1978 = vmatpush.bf16.msra.mxu2 %v1815_v7  ;;  %1941 = vmatpush.bf16.msrb.mxu3 %v1685_v11  ;;  %v1870_v55 = vpack.c.bf16 %v1570_v49, %v1565_v42  ;;  %v1060_v62 = vunpack.c.1.s8 %v645_v27  ;;  %v1910_v63 = vpack.c.bf16 %v1650_v56, %v1645_v52  ;;  %v1425_v0 = vcvt.s32.f32 %v925_v57  ;;  %v566_v7 = vld [vmem:[%s2914_s22 + $0x80] sm:$0xff]  ;;  %v635_v56 = vld [vmem:[%s2914_s22 + $0x2a8] sm:$0xff] }
  0x56   : > { %v1430_v1 = vcvt.s32.f32 %v930_v58  ;;  %v1790_v3 = vpack.c.bf16 %v1410_v60, %v1405_v59  ;;  %v1555_v4 = vcvt.s32.f32 %v1055_v61  ;;  %v1140_v6 = vunpack.c.1.s8 %v665_v31 }
  0x57   : > { %1953 = vmatpush.bf16.msra.mxu0 %v1730_v2  ;;  %v1135_v2 = vunpack.c.0.s8 %v665_v31  ;;  %v1560_v5 = vcvt.s32.f32 %v1060_v62  ;;  %v895_v10 = vunpack.c.0.s8 %v605_v44  ;;  %v900_v11 = vunpack.c.1.s8 %v605_v44 }
  0x58   : > { %v1800_v8 = vpack.c.bf16 %v1430_v1, %v1425_v0  ;;  %1962 = vmatpush.bf16.msra.mxu1 %v1790_v3  ;;  %v1640_v14 = vcvt.s32.f32 %v1140_v6  ;;  %v915_v15 = vunpack.c.0.s8 %v610_v38  ;;  %v920_v16 = vunpack.c.1.s8 %v610_v38  ;;  %v655_v1 = vld [vmem:[%s2914_s22 + $0x348] sm:$0xff] }
  0x59   : > { %1979 = vmatpush.bf16.msra.mxu2 %v1810_v23  ;;  %1942 = vmatpush.bf16.msrb.mxu3 %v1680_v33  ;;  %v1635_v9 = vcvt.s32.f32 %v1135_v2  ;;  %v1865_v13 = vpack.c.bf16 %v1560_v5, %v1555_v4  ;;  %v1395_v17 = vcvt.s32.f32 %v895_v10  ;;  %v1400_v18 = vcvt.s32.f32 %v900_v11  ;;  %v595_v6 = vld [vmem:[%s2914_s22 + $0x168] sm:$0xff] }
  0x5a   : > { %v751_v20 = vunpack.c.3.s8 %v566_v7  ;;  %v1415_v23 = vcvt.s32.f32 %v915_v15  ;;  %v1420_v24 = vcvt.s32.f32 %v920_v16  ;;  %v1045_v25 = vunpack.c.2.s8 %v640_v12 }
  0x5b   : > { %1954 = vmatpush.bf16.msra.mxu0 %v1725_v19  ;;  %v746_v19 = vunpack.c.2.s8 %v566_v7  ;;  %v1905_v22 = vpack.c.bf16 %v1640_v14, %v1635_v9  ;;  %v1785_v27 = vpack.c.bf16 %v1400_v18, %v1395_v17  ;;  %v1050_v29 = vunpack.c.3.s8 %v640_v12 }
  0x5c   : > { %v1251_v28 = vcvt.s32.f32 %v751_v20  ;;  %v1795_v30 = vpack.c.bf16 %v1420_v24, %v1415_v23  ;;  %v1545_v31 = vcvt.s32.f32 %v1045_v25  ;;  %v1130_v34 = vunpack.c.3.s8 %v660_v21 }
  0x5d   : > { %1980 = vmatpush.bf16.msra.mxu2 %v1805_v45  ;;  %1943 = vmatpush.bf16.msrb.mxu3 %v1675_v39  ;;  %v1246_v33 = vcvt.s32.f32 %v746_v19  ;;  %v1550_v36 = vcvt.s32.f32 %v1050_v29  ;;  %v885_v37 = vunpack.c.2.s8 %v600_v26  ;;  %v890_v40 = vunpack.c.3.s8 %v600_v26 }
  0x5e   : > { %1963 = vmatpush.bf16.msra.mxu1 %v1785_v27  ;;  %v1630_v43 = vcvt.s32.f32 %v1130_v34  ;;  %v736_v44 = vunpack.c.0.s8 %v566_v7  ;;  %v741_v45 = vunpack.c.1.s8 %v566_v7  ;;  %v1035_v38 = vunpack.c.0.s8 %v640_v12 }
  0x5f   : > { %1955 = vmatpush.bf16.msra.mxu0 %v1720_v32  ;;  %v1125_v32 = vunpack.c.2.s8 %v660_v21  ;;  %v1711_v35 = vpack.c.bf16 %v1251_v28, %v1246_v33  ;;  %v1860_v46 = vpack.c.bf16 %v1550_v36, %v1545_v31  ;;  %v1385_v47 = vcvt.s32.f32 %v885_v37 }
  0x60   : > { %v1390_v48 = vcvt.s32.f32 %v890_v40  ;;  %v1236_v42 = vcvt.s32.f32 %v736_v44  ;;  %v1241_v49 = vcvt.s32.f32 %v741_v45  ;;  %v1040_v50 = vunpack.c.1.s8 %v640_v12 }
  0x61   : > { %1988 = vmatpush.bf16.msra.mxu3 %v1870_v55  ;;  %1981 = vmatpush.bf16.msra.mxu2 %v1800_v8  ;;  %v1625_v41 = vcvt.s32.f32 %v1125_v32  ;;  %v1535_v53 = vcvt.s32.f32 %v1035_v38  ;;  %v1115_v54 = vunpack.c.0.s8 %v660_v21  ;;  %v1120_v55 = vunpack.c.1.s8 %v660_v21  ;;  %v556_v38 = vld [vmem:[%s2914_s22 + $0x30] sm:$0xff] }
  0x62   : > { %v1780_v52 = vpack.c.bf16 %v1390_v48, %v1385_v47  ;;  %v1706_v57 = vpack.c.bf16 %v1241_v49, %v1236_v42  ;;  %v1540_v58 = vcvt.s32.f32 %v1040_v50  ;;  %v875_v59 = vunpack.c.0.s8 %v600_v26  ;;  %v630_v49 = vld [vmem:[%s2914_s22 + $0x280] sm:$0xff] }
  0x63   : > { %1956 = vmatpush.bf16.msra.mxu0 %v1715_v51  ;;  %v1900_v39 = vpack.c.bf16 %v1630_v43, %v1625_v41  ;;  %v561_v51 = vld [vmem:[%s2914_s22 + $0x58] sm:$0xff]  ;;  %v880_v60 = vunpack.c.1.s8 %v600_v26  ;;  %v1615_v61 = vcvt.s32.f32 %v1115_v54  ;;  %v1620_v62 = vcvt.s32.f32 %v1120_v55  ;;  %v650_v50 = vld [vmem:[%s2914_s22 + $0x320] sm:$0xff] }
  0x64   : > { %1964 = vmatpush.bf16.msra.mxu1 %v1780_v52  ;;  %v731_v0 = vunpack.c.3.s8 %v561_v51  ;;  %v1855_v2 = vpack.c.bf16 %v1540_v58, %v1535_v53  ;;  %v1375_v3 = vcvt.s32.f32 %v875_v59  ;;  %v1025_v5 = vunpack.c.2.s8 %v635_v56 }
  0x65   : > { %1989 = vmatpush.bf16.msra.mxu3 %v1865_v13  ;;  %1982 = vmatpush.bf16.msra.mxu2 %v1795_v30  ;;  %v1380_v4 = vcvt.s32.f32 %v880_v60  ;;  %v1895_v7 = vpack.c.bf16 %v1620_v62, %v1615_v61  ;;  %v1030_v10 = vunpack.c.3.s8 %v635_v56  ;;  %v1105_v13 = vunpack.c.2.s8 %v655_v1 }
  0x66   : > { %v1231_v9 = vcvt.s32.f32 %v731_v0  ;;  %v1525_v12 = vcvt.s32.f32 %v1025_v5  ;;  %v1110_v14 = vunpack.c.3.s8 %v655_v1  ;;  %v865_v17 = vunpack.c.2.s8 %v595_v6 }
  0x67   : > { %2001 = vmatpush.bf16.msrb.mxu0 %v1910_v63  ;;  %v726_v63 = vunpack.c.2.s8 %v561_v51  ;;  %v1775_v11 = vpack.c.bf16 %v1380_v4, %v1375_v3  ;;  %v1530_v16 = vcvt.s32.f32 %v1030_v10  ;;  %v870_v18 = vunpack.c.3.s8 %v595_v6 }
  0x68   : > { %v1605_v19 = vcvt.s32.f32 %v1105_v13  ;;  %v1610_v20 = vcvt.s32.f32 %v1110_v14  ;;  %v716_v21 = vunpack.c.0.s8 %v561_v51  ;;  %v1365_v24 = vcvt.s32.f32 %v865_v17  ;;  %v606_v13 = vld [vmem:[%s2914_s22 + $0x1c0] sm:$0xff] }
  0x69   : > { %2027 = vmatpush.bf16.msrb.mxu2 %v1711_v35  ;;  %1990 = vmatpush.bf16.msra.mxu3 %v1860_v46  ;;  %v1226_v8 = vcvt.s32.f32 %v726_v63  ;;  %v1850_v23 = vpack.c.bf16 %v1530_v16, %v1525_v12  ;;  %v1370_v25 = vcvt.s32.f32 %v870_v18  ;;  %v1015_v26 = vunpack.c.0.s8 %v635_v56  ;;  %v3031_v14 = vld [vmem:[%s3019_s13 + $0x8] sm:$0x1f] }
  0x6a   : > { %1965 = vmatpush.bf16.msra.mxu1 %v1775_v11  ;;  %v1890_v27 = vpack.c.bf16 %v1610_v20, %v1605_v19  ;;  %v1216_v33 = vcvt.s32.f32 %v716_v21  ;;  %v1020_v29 = vunpack.c.1.s8 %v635_v56  ;;  %v1095_v32 = vunpack.c.0.s8 %v655_v1  ;;  %v590_v56 = vld [vmem:[%s2914_s22 + $0x140] sm:$0xff] }
  0x6b   : > { %2002 = vmatpush.bf16.msrb.mxu0 %v1905_v22  ;;  %v1701_v15 = vpack.c.bf16 %v1231_v9, %v1226_v8  ;;  %v721_v22 = vunpack.c.1.s8 %v561_v51  ;;  %v1770_v30 = vpack.c.bf16 %v1370_v25, %v1365_v24  ;;  %v1515_v31 = vcvt.s32.f32 %v1015_v26  ;;  %v3025_v51 = vld [vmem:[%s3019_s13] sm:$0x1f]  ;;  %v3035_v25 = vld [vmem:[%s3019_s13 + $0x10] sm:$0x1f] }
  0x6c   : > { %v1100_v34 = vunpack.c.1.s8 %v655_v1  ;;  %v1520_v36 = vcvt.s32.f32 %v1020_v29  ;;  %v855_v37 = vunpack.c.0.s8 %v595_v6  ;;  %v860_v40 = vunpack.c.1.s8 %v595_v6 }
  0x6d   : > { %2028 = vmatpush.bf16.msrb.mxu2 %v1706_v57  ;;  %1991 = vmatpush.bf16.msra.mxu3 %v1855_v2  ;;  %v1221_v28 = vcvt.s32.f32 %v721_v22  ;;  %v1595_v41 = vcvt.s32.f32 %v1095_v32  ;;  %v711_v42 = vunpack.c.3.s8 %v556_v38  ;;  %v1005_v54 = vunpack.c.2.s8 %v630_v49 }
  0x6e   : > { %1966 = vmatpush.bf16.msra.mxu1 %v1770_v30  ;;  %v1600_v43 = vcvt.s32.f32 %v1100_v34  ;;  %v1845_v44 = vpack.c.bf16 %v1520_v36, %v1515_v31  ;;  %v1355_v45 = vcvt.s32.f32 %v855_v37  ;;  %v1360_v46 = vcvt.s32.f32 %v860_v40  ;;  %v551_v34 = vld [vmem:[%s2914_s22 + $0x8] sm:$0xff] }
  0x6f   : > { %2003 = vmatpush.bf16.msrb.mxu0 %v1900_v39  ;;  %v1696_v35 = vpack.c.bf16 %v1221_v28, %v1216_v33  ;;  %v706_v39 = vunpack.c.2.s8 %v556_v38  ;;  %v1211_v53 = vcvt.s32.f32 %v711_v42  ;;  %v1010_v55 = vunpack.c.3.s8 %v630_v49  ;;  %v670_v28 = vld [vmem:[%s2914_s22 + $0x3c0] sm:$0xff] }
  0x70   : > { %v1885_v47 = vpack.c.bf16 %v1600_v43, %v1595_v41  ;;  %v1765_v48 = vpack.c.bf16 %v1360_v46, %v1355_v45  ;;  %v1085_v57 = vunpack.c.2.s8 %v650_v50  ;;  %v1090_v58 = vunpack.c.3.s8 %v650_v50  ;;  %v3044_v41 = vld [vmem:[%s3019_s13 + $0x18] sm:$0x1f] }
  0x71   : > { %2029 = vmatpush.bf16.msrb.mxu2 %v1701_v15  ;;  %1992 = vmatpush.bf16.msra.mxu3 %v1850_v23  ;;  %v1206_v52 = vcvt.s32.f32 %v706_v39  ;;  %v845_v59 = vunpack.c.2.s8 %v590_v56  ;;  %v850_v60 = vunpack.c.3.s8 %v590_v56  ;;  %v1505_v62 = vcvt.s32.f32 %v1005_v54  ;;  %v626_v23 = vld [vmem:[%s2914_s22 + $0x260] sm:$0xff] }
  0x72   : > { %1967 = vmatpush.bf16.msra.mxu1 %v1765_v48  ;;  %v1510_v63 = vcvt.s32.f32 %v1010_v55  ;;  %v696_v0 = vunpack.c.0.s8 %v556_v38  ;;  %v365_v1 = vperm.slane %v3025_v51, 0  ;;  %v1585_v2 = vcvt.s32.f32 %v1085_v57 }
  0x73   : > { %2004 = vmatpush.bf16.msrb.mxu0 %v1895_v7  ;;  %v1691_v61 = vpack.c.bf16 %v1211_v53, %v1206_v52  ;;  %v1590_v3 = vcvt.s32.f32 %v1090_v58  ;;  %v1345_v4 = vcvt.s32.f32 %v845_v59  ;;  %v1350_v6 = vcvt.s32.f32 %v850_v60 }
  0x74   : > { %v1840_v5 = vpack.c.bf16 %v1510_v63, %v1505_v62  ;;  %v701_v7 = vunpack.c.1.s8 %v556_v38  ;;  %v1196_v8 = vcvt.s32.f32 %v696_v0  ;;  %v995_v10 = vunpack.c.0.s8 %v630_v49 }
  0x75   : > { %2030 = vmatpush.bf16.msrb.mxu2 %v1696_v35  ;;  %1993 = vmatpush.bf16.msra.mxu3 %v1845_v44  ;;  %v1880_v9 = vpack.c.bf16 %v1590_v3, %v1585_v2  ;;  %v1000_v11 = vunpack.c.1.s8 %v630_v49  ;;  %v1075_v12 = vunpack.c.0.s8 %v650_v50  ;;  %v1760_v15 = vpack.c.bf16 %v1350_v6, %v1345_v4 }
  0x76   : > { %v1201_v16 = vcvt.s32.f32 %v701_v7  ;;  %v1080_v17 = vunpack.c.1.s8 %v650_v50  ;;  %v835_v18 = vunpack.c.0.s8 %v590_v56  ;;  %v1495_v19 = vcvt.s32.f32 %v995_v10  ;;  %v646_v7 = vld [vmem:[%s2914_s22 + $0x300] sm:$0xff] }
  0x77   : > { %2005 = vmatpush.bf16.msrb.mxu0 %v1890_v27  ;;  %v1500_v20 = vcvt.s32.f32 %v1000_v11  ;;  %v1575_v21 = vcvt.s32.f32 %v1075_v12  ;;  %v840_v22 = vunpack.c.1.s8 %v590_v56  ;;  %1968 = vmatpush.bf16.msra.mxu1 %v1760_v15  ;;  %v906_v33 = vunpack.c.2.s8 %v606_v13  ;;  %v601_v12 = vld [vmem:[%s2914_s22 + $0x198] sm:$0xff] }
  0x78   : > { %v1686_v24 = vpack.c.bf16 %v1201_v16, %v1196_v8  ;;  %v1580_v26 = vcvt.s32.f32 %v1080_v17  ;;  %v1335_v27 = vcvt.s32.f32 %v835_v18  ;;  %v366_v29 = vperm.slane %v3031_v14, 0  ;;  %v621_v18 = vld [vmem:[%s2914_s22 + $0x238] sm:$0xff] }
  0x79   : > { %2031 = vmatpush.bf16.msrb.mxu2 %v1691_v61  ;;  %1994 = vmatpush.bf16.msra.mxu3 %v1840_v5  ;;  %v367_v30 = vperm.slane %v3035_v25, 0  ;;  %v1835_v31 = vpack.c.bf16 %v1500_v20, %v1495_v19  ;;  %v1340_v32 = vcvt.s32.f32 %v840_v22  ;;  %v911_v36 = vunpack.c.3.s8 %v606_v13  ;;  %v586_v61 = vld [vmem:[%s2914_s22 + $0x120] sm:$0xff]  ;;  %v3215_v25 = vld [vmem:[%s2914_s22 + $0x1e8] sm:$0xff] }
  0x7a   : > { %v1875_v35 = vpack.c.bf16 %v1580_v26, %v1575_v21  ;;  %v3041_v37 = vcvt.s32.f32 %v906_v33  ;;  %v986_v40 = vunpack.c.2.s8 %v626_v23  ;;  %v991_v44 = vunpack.c.3.s8 %v626_v23  ;;  %v3076_v33 = vld [vmem:[%s3019_s13 + $0x20] sm:$0x1f] }
  0x7b   : > { %2006 = vmatpush.bf16.msrb.mxu0 %v1885_v47  ;;  %v1755_v43 = vpack.c.bf16 %v1340_v32, %v1335_v27  ;;  %v1165_v45 = vunpack.c.2.s8 %v670_v28  ;;  %v1170_v46 = vunpack.c.3.s8 %v670_v28  ;;  %v3046_v47 = vcvt.s32.f32 %v911_v36 }
  0x7c   : > { %v3048_v48 = vcvt.s32.f32 %v986_v40  ;;  %v686_v38 = vunpack.c.2.s8 %v551_v34  ;;  %v691_v39 = vunpack.c.3.s8 %v551_v34  ;;  %v3050_v42 = vcvt.s32.f32 %v991_v44  ;;  %v3089_v44 = vld [vmem:[%s3019_s13 + $0x28] sm:$0x1f] }
  0x7d   : > { %2032 = vmatpush.bf16.msrb.mxu2 %v1686_v24  ;;  %1995 = vmatpush.bf16.msra.mxu3 %v1835_v31  ;;  %v1665_v49 = vcvt.s32.f32 %v1165_v45  ;;  %v1670_v50 = vcvt.s32.f32 %v1170_v46  ;;  %v896_v52 = vunpack.c.0.s8 %v606_v13  ;;  %v368_v53 = vperm.slane %v3044_v41, 0 }
  0x7e   : > { %1969 = vmatpush.bf16.msra.mxu1 %v1755_v43  ;;  %v1186_v54 = vcvt.s32.f32 %v686_v38  ;;  %v1191_v55 = vcvt.s32.f32 %v691_v39  ;;  %v901_v56 = vunpack.c.1.s8 %v606_v13  ;;  %v1791_v57 = vpack.c.bf16 %v3046_v47, %v3041_v37 }
  0x7f   : > { %2007 = vmatpush.bf16.msrb.mxu0 %v1880_v9  ;;  %v1920_v58 = vpack.c.bf16 %v1670_v50, %v1665_v49  ;;  %v3055_v59 = vcvt.s32.f32 %v896_v52  ;;  %v976_v60 = vunpack.c.0.s8 %v626_v23  ;;  %v981_v0 = vunpack.c.1.s8 %v626_v23 }
  0x80   : > { %v1681_v62 = vpack.c.bf16 %v1191_v55, %v1186_v54  ;;  %v3058_v63 = vcvt.s32.f32 %v901_v56  ;;  %v1155_v2 = vunpack.c.0.s8 %v670_v28  ;;  %v1831_v3 = vpack.c.bf16 %v3050_v42, %v3048_v48 }
  0x81   : > { %v1160_v4 = vunpack.c.1.s8 %v670_v28  ;;  %v676_v5 = vunpack.c.0.s8 %v551_v34  ;;  %v681_v6 = vunpack.c.1.s8 %v551_v34  ;;  %v3063_v8 = vcvt.s32.f32 %v976_v60 }
  0x82   : > { %2020 = vmatpush.bf16.msrb.mxu1 %v1920_v58  ;;  %2033 = vmatpush.bf16.msrb.mxu2 %v1681_v62  ;;  %v3065_v9 = vcvt.s32.f32 %v981_v0  ;;  %v1655_v10 = vcvt.s32.f32 %v1155_v2  ;;  %v826_v11 = vunpack.c.2.s8 %v586_v61  ;;  %v831_v17 = vunpack.c.3.s8 %v586_v61  ;;  %v581_v62 = vld [vmem:[%s2914_s22 + $0xf8] sm:$0xff] }
  0x83   : > { %2008 = vmatpush.bf16.msrb.mxu0 %v1875_v35  ;;  %v1660_v13 = vcvt.s32.f32 %v1160_v4  ;;  %v1176_v15 = vcvt.s32.f32 %v676_v5  ;;  %v1181_v16 = vcvt.s32.f32 %v681_v6  ;;  %v1066_v21 = vunpack.c.2.s8 %v646_v7 }
  0x84   : > { %v3071_v20 = vcvt.s32.f32 %v826_v11  ;;  %v1071_v22 = vunpack.c.3.s8 %v646_v7  ;;  %v3073_v26 = vcvt.s32.f32 %v831_v17  ;;  %v886_v27 = vunpack.c.2.s8 %v601_v12  ;;  %v596_v17 = vld [vmem:[%s2914_s22 + $0x170] sm:$0xff] }
  0x85   : > { %v1915_v23 = vpack.c.bf16 %v1660_v13, %v1655_v10  ;;  %v1676_v24 = vpack.c.bf16 %v1181_v16, %v1176_v15  ;;  %v3078_v28 = vcvt.s32.f32 %v1066_v21  ;;  %v891_v32 = vunpack.c.3.s8 %v601_v12 }
  0x86   : > { %v3080_v31 = vcvt.s32.f32 %v1071_v22  ;;  %v966_v34 = vunpack.c.2.s8 %v621_v18  ;;  %v3086_v40 = vcvt.s32.f32 %v886_v27  ;;  %v971_v43 = vunpack.c.3.s8 %v621_v18  ;;  %v3127_v27 = vld [vmem:[%s3019_s13 + $0x30] sm:$0x1f] }
  0x87   : > { %2021 = vmatpush.bf16.msrb.mxu1 %v1915_v23  ;;  %2034 = vmatpush.bf16.msrb.mxu2 %v1676_v24  ;;  %v3093_v46 = vcvt.s32.f32 %v891_v32  ;;  %v816_v50 = vunpack.c.0.s8 %v586_v61  ;;  %v821_v52 = vunpack.c.1.s8 %v586_v61  ;;  %v1056_v54 = vunpack.c.0.s8 %v646_v7  ;;  %v641_v61 = vld [vmem:[%s2914_s22 + $0x2d8] sm:$0xff]  ;;  %v616_v32 = vld [vmem:[%s2914_s22 + $0x210] sm:$0xff] }
  0x88   : > { %v3095_v38 = vcvt.s32.f32 %v966_v34  ;;  %v3098_v49 = vcvt.s32.f32 %v971_v43  ;;  %v1061_v56 = vunpack.c.1.s8 %v646_v7  ;;  %v876_v58 = vunpack.c.0.s8 %v601_v12 }
  0x89   : > { %v881_v60 = vunpack.c.1.s8 %v601_v12  ;;  %v3104_v2 = vcvt.s32.f32 %v816_v50  ;;  %v3106_v4 = vcvt.s32.f32 %v821_v52  ;;  %v3108_v5 = vcvt.s32.f32 %v1056_v54 }
  0x8a   : > { %v3111_v6 = vcvt.s32.f32 %v1061_v56  ;;  %v3113_v10 = vcvt.s32.f32 %v876_v58  ;;  %v956_v11 = vunpack.c.0.s8 %v621_v18  ;;  %v961_v13 = vunpack.c.1.s8 %v621_v18 }
  0x8b   : > { %v3115_v7 = vcvt.s32.f32 %v881_v60  ;;  %v806_v15 = vunpack.c.2.s8 %v581_v62  ;;  %v811_v16 = vunpack.c.3.s8 %v581_v62  ;;  %v1046_v24 = vunpack.c.2.s8 %v641_v61 }
  0x8c   : > { %v3124_v23 = vcvt.s32.f32 %v956_v11  ;;  %v3130_v34 = vcvt.s32.f32 %v961_v13  ;;  %v1051_v50 = vunpack.c.3.s8 %v641_v61  ;;  %v866_v56 = vunpack.c.2.s8 %v596_v17 }
  0x8d   : > { %v3132_v43 = vcvt.s32.f32 %v806_v15  ;;  %v3134_v18 = vcvt.s32.f32 %v811_v16  ;;  %v3138_v54 = vcvt.s32.f32 %v1046_v24  ;;  %v871_v58 = vunpack.c.3.s8 %v596_v17 }
  0x8e   : > { %v3142_v11 = vcvt.s32.f32 %v1051_v50  ;;  %v946_v22 = vunpack.c.2.s8 %v616_v32  ;;  %v3145_v15 = vcvt.s32.f32 %v866_v56  ;;  %v951_v21 = vunpack.c.3.s8 %v616_v32 }
  0x8f   : > { %v3147_v16 = vcvt.s32.f32 %v871_v58  ;;  %v796_v55 = vunpack.c.0.s8 %v581_v62  ;;  %v801_v0 = vunpack.c.1.s8 %v581_v62  ;;  %v1036_v60 = vunpack.c.0.s8 %v641_v61 }
  0x90   : > { %v3151_v12 = vcvt.s32.f32 %v946_v22  ;;  %v3159_v13 = vcvt.s32.f32 %v951_v21  ;;  %v1041_v22 = vunpack.c.1.s8 %v641_v61  ;;  %v856_v14 = vunpack.c.0.s8 %v596_v17 }
  0x91   : > { %v3161_v45 = vcvt.s32.f32 %v796_v55  ;;  %v3163_v24 = vcvt.s32.f32 %v801_v0  ;;  %v3165_v62 = vcvt.s32.f32 %v1036_v60  ;;  %v861_v21 = vunpack.c.1.s8 %v596_v17  ;;  %v3174_v55 = vld [vmem:[%s2914_s22 + $0xd0] sm:$0xff] }
  0x92   : > { %v3177_v0 = vld [vmem:[%s2914_s22 + $0x2b0] sm:$0xff] }
  0x93   : > { %v3189_v17 = vcvt.s32.f32 %v861_v21 }
  0xbb   : > { %v461_v39 = vpop.f32.mrf.mxu0  ;;  %v474_v52 = vpop.f32.mrf.mxu1 }
  0xbc   : > { %v462_v50 = vadd.f32 %v461_v39, %v365_v1  ;;  %v475_v56 = vadd.f32 %v474_v52, %v366_v29  ;;  %v3171_v39 = vcvt.s32.f32 %v1041_v22  ;;  %v936_v52 = vunpack.c.0.s8 %v616_v32  ;;  %v591_v22 = vld [vmem:[%s2914_s22 + $0x148] sm:$0xff] }
  0xbe   : > { %v543_v36 = vmax.f32 %v462_v50, 0.0  ;;  %v544_v51 = vmax.f32 %v475_v56, 0.0  ;;  %v3183_v50 = vcvt.s32.f32 %v856_v14  ;;  %v941_v56 = vunpack.c.1.s8 %v616_v32 }
  0xbf   : > { %v3191_v29 = vcvt.s32.f32 %v936_v52  ;;  %v786_v32 = vunpack.c.2.s8 %v3174_v55  ;;  %v1026_v14 = vunpack.c.2.s8 %v3177_v0 }
  0xc0   : > { %v3179_v61 = vpack.c.bf16 %v543_v36, %v543_v36  ;;  %v3181_v60 = vpack.c.bf16 %v544_v51, %v544_v51  ;;  %v3195_v36 = vcvt.s32.f32 %v941_v56  ;;  %v791_v51 = vunpack.c.3.s8 %v3174_v55 }
  0xc1   : > { %v1766_v19 = vpack.c.bf16 %v3189_v17, %v3183_v50  ;;  %v3219_v41 = vcvt.s32.f32 %v786_v32  ;;  %v3223_v47 = vcvt.s32.f32 %v1026_v14  ;;  %v3270_v14 = vld [vmem:[%s2914_s22 + $0x3c8] sm:$0xff] }
  0xc2   : > { %3746 = vst [vmem:[#allocation5_spill] sm:$0xff] %v3181_v60  ;;  %1944 = vmatmul.bf16.vlgmr.msrb.gmra.mxu3 %v3179_v61  ;;  %1957 = vmatmul.bf16.vlgmr.msra.gmra.mxu0 %v3181_v60  ;;  %v1031_v60 = vunpack.c.3.s8 %v3177_v0  ;;  %v3221_v37 = vcvt.s32.f32 %v791_v51  ;;  %v3747_v51 = vpack.c.bf16 %v3058_v63, %v3055_v59  ;;  %v781_v59 = vunpack.c.1.s8 %v3174_v55 }
  0xc3   : > { %v487_v58 = vpop.f32.mrf.mxu2  ;;  %v500_v35 = vpop.f32.mrf.mxu3  ;;  %2053 = vmatpush.bf16.msrb.mxu3 %v1791_v57  ;;  %2066 = vmatpush.bf16.msra.mxu0 %v1831_v3  ;;  %v846_v57 = vunpack.c.2.s8 %v591_v22  ;;  %v1016_v63 = vunpack.c.0.s8 %v3177_v0 }
  0xc4   : > { %v488_v21 = vadd.f32 %v487_v58, %v367_v30  ;;  %v501_v52 = vadd.f32 %v500_v35, %v368_v53  ;;  %v463_v56 = vpop.f32.mrf.mxu0  ;;  %v476_v1 = vpop.f32.mrf.mxu1  ;;  %v1806_v30 = vpack.c.bf16 %v3195_v36, %v3191_v29  ;;  %v3225_v53 = vcvt.s32.f32 %v1031_v60 }
  0xc5   : > { %v851_v35 = vunpack.c.3.s8 %v591_v22  ;;  %v926_v58 = vunpack.c.2.s8 %v3215_v25  ;;  %v931_v1 = vunpack.c.3.s8 %v3215_v25  ;;  %v3748_v60 = vpack.c.bf16 %v3065_v9, %v3063_v8 }
  0xc6   : > { %v545_v48 = vmax.f32 %v488_v21, 0.0  ;;  %v546_v42 = vmax.f32 %v501_v52, 0.0  ;;  %v3243_v21 = vcvt.s32.f32 %v846_v57  ;;  %v1021_v8 = vunpack.c.1.s8 %v3177_v0 }
  0xc7   : > { %2054 = vmatpush.bf16.msrb.mxu3 %v3747_v51  ;;  %2067 = vmatpush.bf16.msra.mxu0 %v3748_v60  ;;  %v3245_v52 = vcvt.s32.f32 %v851_v35  ;;  %v3247_v3 = vcvt.s32.f32 %v926_v58  ;;  %v836_v9 = vunpack.c.0.s8 %v591_v22  ;;  %v3749_v57 = vpack.c.bf16 %v3073_v26, %v3071_v20 }
  0xc8   : > { %v3231_v56 = vpack.c.bf16 %v545_v48, %v545_v48  ;;  %v3233_v32 = vpack.c.bf16 %v546_v42, %v546_v42  ;;  %v3249_v48 = vcvt.s32.f32 %v931_v1  ;;  %v776_v42 = vunpack.c.0.s8 %v3174_v55 }
  0xc9   : > { %v3750_v35 = vpack.c.bf16 %v3080_v31, %v3078_v28  ;;  %v1761_v51 = vpack.c.bf16 %v3245_v52, %v3243_v21  ;;  %v841_v0 = vunpack.c.1.s8 %v591_v22  ;;  %v3751_v20 = vpack.c.bf16 %v3093_v46, %v3086_v40 }
  0xca   : > { %1970 = vmatmul.bf16.vlgmr.msra.gmra.mxu1 %v3231_v56  ;;  %1983 = vmatmul.bf16.vlgmr.msra.gmra.mxu2 %v3233_v32  ;;  %v1801_v55 = vpack.c.bf16 %v3249_v48, %v3247_v3  ;;  %v3267_v60 = vcvt.s32.f32 %v776_v42  ;;  %v3752_v26 = vpack.c.bf16 %v3098_v49, %v3095_v38  ;;  %v3282_v42 = vcvt.s32.f32 %v1021_v8  ;;  %v3294_v49 = vld [vmem:[%s2914_s22 + $0x88] sm:$0xff] }
  0xcb   : > { %2040 = vmatpush.bf16.msra.mxu1 %v3749_v57  ;;  %2079 = vmatpush.bf16.msra.mxu2 %v3750_v35  ;;  %v489_v58 = vpop.f32.mrf.mxu2  ;;  %v502_v1 = vpop.f32.mrf.mxu3  ;;  %v3278_v57 = vcvt.s32.f32 %v781_v59  ;;  %v3280_v35 = vcvt.s32.f32 %v1016_v63  ;;  %v3284_v22 = vcvt.s32.f32 %v836_v9  ;;  %v3754_v40 = vperm.slane %v3089_v44, 0  ;;  %v3303_v9 = vld [vmem:[%s2914_s22 + $0xa8] sm:$0xff] }
  0xcc   : > { %2055 = vmatpush.bf16.msrb.mxu3 %v3751_v20  ;;  %2068 = vmatpush.bf16.msra.mxu0 %v3752_v26  ;;  %v513_v28 = vpop.f32.mrf.mxu0  ;;  %v526_v31 = vpop.f32.mrf.mxu1  ;;  %v3753_v58 = vperm.slane %v3076_v33, 0  ;;  %v3290_v20 = vcvt.s32.f32 %v841_v0  ;;  %v916_v38 = vunpack.c.0.s8 %v3215_v25  ;;  %v921_v8 = vunpack.c.1.s8 %v3215_v25 }
  0xcd   : > { %v527_v46 = vadd.f32 %v526_v31, %v3754_v40  ;;  %v1726_v59 = vpack.c.bf16 %v3278_v57, %v3267_v60  ;;  %v1846_v63 = vpack.c.bf16 %v3282_v42, %v3280_v35  ;;  %v1166_v33 = vunpack.c.2.s8 %v3270_v14  ;;  %v3328_v40 = vld [vmem:[%s2914_s22 + $0x288] sm:$0xff] }
  0xce   : > { %v514_v1 = vadd.f32 %v513_v28, %v3753_v58  ;;  %v3755_v26 = vpack.c.bf16 %v3106_v4, %v3104_v2  ;;  %v3756_v28 = vpack.c.bf16 %v3111_v6, %v3108_v5  ;;  %v1756_v31 = vpack.c.bf16 %v3290_v20, %v3284_v22 }
  0xcf   : > { %v548_v0 = vmax.f32 %v527_v46, 0.0  ;;  %v3313_v25 = vcvt.s32.f32 %v916_v38  ;;  %v3757_v58 = vpack.c.bf16 %v3115_v7, %v3113_v10  ;;  %v3321_v2 = vcvt.s32.f32 %v921_v8 }
  0xd0   : > { %v547_v44 = vmax.f32 %v514_v1, 0.0  ;;  %2041 = vmatpush.bf16.msra.mxu1 %v3755_v26  ;;  %2080 = vmatpush.bf16.msra.mxu2 %v3756_v28  ;;  %v3758_v1 = vpack.c.bf16 %v3130_v34, %v3124_v23  ;;  %v1171_v4 = vunpack.c.3.s8 %v3270_v14  ;;  %v3324_v5 = vcvt.s32.f32 %v1166_v33 }
  0xd1   : > { %2056 = vmatpush.bf16.msrb.mxu3 %v3757_v58  ;;  %v747_v6 = vunpack.c.2.s8 %v3294_v49  ;;  %v3332_v38 = vpack.c.bf16 %v548_v0, %v548_v0  ;;  %v752_v10 = vunpack.c.3.s8 %v3294_v49  ;;  %v766_v7 = vunpack.c.2.s8 %v3303_v9 }
  0xd2   : > { %2069 = vmatpush.bf16.msra.mxu0 %v3758_v1  ;;  %v3330_v46 = vpack.c.bf16 %v547_v44, %v547_v44  ;;  %v3338_v34 = vcvt.s32.f32 %v1171_v4  ;;  %v771_v33 = vunpack.c.3.s8 %v3303_v9  ;;  %v3759_v26 = vpack.c.bf16 %v3134_v18, %v3132_v43 }
  0xd3   : > { %v3340_v8 = vcvt.s32.f32 %v747_v6  ;;  %v3760_v44 = vpack.c.bf16 %v3142_v11, %v3138_v54  ;;  %v539_v0 = vpop.f32.mrf.mxu2  ;;  %v3349_v28 = vcvt.s32.f32 %v752_v10  ;;  %v3351_v58 = vcvt.s32.f32 %v766_v7  ;;  %2009 = vmatmul.bf16.vlgmr.msrb.gmra.mxu0 %v3332_v38 }
  0xd4   : > { %2042 = vmatpush.bf16.msra.mxu1 %v3759_v26  ;;  %v1006_v1 = vunpack.c.2.s8 %v3328_v40  ;;  %v1011_v4 = vunpack.c.3.s8 %v3328_v40  ;;  %v3761_v6 = vperm.slane %v3127_v27, 0  ;;  %1996 = vmatmul.bf16.vlgmr.msra.gmra.mxu3 %v3330_v46  ;;  %v1921_v43 = vpack.c.bf16 %v3338_v34, %v3324_v5  ;;  %v515_v11 = vpop.f32.mrf.mxu0  ;;  %v528_v10 = vpop.f32.mrf.mxu1 }
  0xd5   : > { %2081 = vmatpush.bf16.msra.mxu2 %v3760_v44  ;;  %v3361_v18 = vcvt.s32.f32 %v771_v33  ;;  %v1156_v54 = vunpack.c.0.s8 %v3270_v14  ;;  %v3762_v7 = vpack.c.bf16 %v3147_v16, %v3145_v15  ;;  %v3763_v27 = vpack.c.bf16 %v3159_v13, %v3151_v12  ;;  %v607_v11 = vld [vmem:[%s2914_s22 + $0x1c8] sm:$0xff] }
  0xd6   : > { %v540_v23 = vadd.f32 %v539_v0, %v3761_v6  ;;  %v1712_v26 = vpack.c.bf16 %v3349_v28, %v3340_v8  ;;  %v3372_v44 = vcvt.s32.f32 %v1006_v1  ;;  %v3374_v33 = vcvt.s32.f32 %v1011_v4 }
  0xd7   : > { %2057 = vmatpush.bf16.msrb.mxu3 %v3762_v7  ;;  %2070 = vmatpush.bf16.msra.mxu0 %v3763_v27  ;;  %v1161_v0 = vunpack.c.1.s8 %v3270_v14  ;;  %v1721_v15 = vpack.c.bf16 %v3361_v18, %v3351_v58  ;;  %v3379_v16 = vcvt.s32.f32 %v1156_v54  ;;  %v737_v12 = vunpack.c.0.s8 %v3294_v49 }
  0xd8   : > { %v549_v6 = vmax.f32 %v540_v23, 0.0  ;;  %v3764_v13 = vpack.c.bf16 %v3163_v24, %v3161_v45  ;;  %v3765_v1 = vpack.c.bf16 %v3171_v39, %v3165_v62  ;;  %v1841_v14 = vpack.c.bf16 %v3374_v33, %v3372_v44  ;;  %v666_v62 = vld [vmem:[%s2914_s22 + $0x3a0] sm:$0xff] }
  0xd9   : > { %v3390_v23 = vcvt.s32.f32 %v1161_v0  ;;  %v742_v4 = vunpack.c.1.s8 %v3294_v49  ;;  %v756_v54 = vunpack.c.0.s8 %v3303_v9  ;;  %v3397_v7 = vcvt.s32.f32 %v737_v12  ;;  %v3416_v0 = vld [vmem:[%s2914_s22 + $0x128] sm:$0xff] }
  0xda   : > { %2043 = vmatpush.bf16.msra.mxu1 %v3764_v13  ;;  %2082 = vmatpush.bf16.msra.mxu2 %v3765_v1  ;;  %v3395_v10 = vpack.c.bf16 %v549_v6, %v549_v6  ;;  %v761_v45 = vunpack.c.1.s8 %v3303_v9  ;;  %v996_v24 = vunpack.c.0.s8 %v3328_v40  ;;  %v1001_v9 = vunpack.c.1.s8 %v3328_v40 }
  0xdb   : > { %2058 = vmatpush.bf16.msrb.mxu3 %v1766_v19  ;;  %2071 = vmatpush.bf16.msra.mxu0 %v1806_v30  ;;  %v1916_v39 = vpack.c.bf16 %v3390_v23, %v3379_v16  ;;  %v3410_v49 = vcvt.s32.f32 %v742_v4  ;;  %v3412_v27 = vcvt.s32.f32 %v756_v54  ;;  %v907_v50 = vunpack.c.2.s8 %v607_v11  ;;  %v541_v40 = vpop.f32.mrf.mxu2  ;;  %v562_v4 = vld [vmem:[%s2914_s22 + $0x60] sm:$0xff] }
  0xdc   : > { %2669 = vmatmul.msk.bf16.vlgmr.msrb.gmra.mxu1 %vm1932_vm2, %v3395_v10  ;;  %2035 = vmatmul.bf16.vlgmr.msrb.gmra.mxu2 %v3179_v61  ;;  %v3421_v19 = vcvt.s32.f32 %v761_v45  ;;  %v3423_v29 = vcvt.s32.f32 %v996_v24  ;;  %v912_v17 = vunpack.c.3.s8 %v607_v11  ;;  %v3766_v36 = vpack.c.bf16 %v3221_v37, %v3219_v41 }
  0xdd   : > { %v3767_v30 = vpack.c.bf16 %v3225_v53, %v3223_v47  ;;  %v1707_v6 = vpack.c.bf16 %v3410_v49, %v3397_v7  ;;  %v3433_v12 = vcvt.s32.f32 %v1001_v9  ;;  %v1146_v13 = vunpack.c.2.s8 %v666_v62 }
  0xde   : > { %2044 = vmatpush.bf16.msra.mxu1 %v3766_v36  ;;  %v1151_v1 = vunpack.c.3.s8 %v666_v62  ;;  %v1716_v54 = vpack.c.bf16 %v3421_v19, %v3412_v27  ;;  %v3438_v45 = vcvt.s32.f32 %v907_v50  ;;  %v3440_v41 = vcvt.s32.f32 %v912_v17 }
  0xdf   : > { %2083 = vmatpush.bf16.msra.mxu2 %v3767_v30  ;;  %v827_v37 = vunpack.c.2.s8 %v3416_v0  ;;  %2059 = vmatpush.bf16.msrb.mxu3 %v1761_v51  ;;  %v1836_v47 = vpack.c.bf16 %v3433_v12, %v3423_v29  ;;  %v1646_v53 = vcvt.s32.f32 %v1146_v13  ;;  %v832_v24 = vunpack.c.3.s8 %v3416_v0 }
  0xe0   : > { %2072 = vmatpush.bf16.msra.mxu0 %v1801_v55  ;;  %v1651_v7 = vcvt.s32.f32 %v1151_v1  ;;  %v1792_v49 = vpack.c.bf16 %v3440_v41, %v3438_v45  ;;  %v727_v9 = vunpack.c.2.s8 %v562_v4  ;;  %v732_v19 = vunpack.c.3.s8 %v562_v4 }
  0xe1   : > { %v3454_v27 = vcvt.s32.f32 %v827_v37  ;;  %v1332_v21 = vcvt.s32.f32 %v832_v24  ;;  %v897_v52 = vunpack.c.0.s8 %v607_v11  ;;  %v902_v48 = vunpack.c.1.s8 %v607_v11 }
  0xe2   : > { %2045 = vmatpush.bf16.msra.mxu1 %v1726_v59  ;;  %v1911_v3 = vpack.c.bf16 %v1651_v7, %v1646_v53  ;;  %v1227_v51 = vcvt.s32.f32 %v727_v9  ;;  %v1232_v55 = vcvt.s32.f32 %v732_v19  ;;  %v1136_v29 = vunpack.c.0.s8 %v666_v62  ;;  %v3769_v53 = vld [vmem:[#allocation5_spill] sm:$0xff] }
  0xe3   : > { %2084 = vmatpush.bf16.msra.mxu2 %v1846_v63  ;;  %v1141_v50 = vunpack.c.1.s8 %v666_v62  ;;  %2060 = vmatpush.bf16.msrb.mxu3 %v1756_v31  ;;  %v3768_v60 = vpack.c.bf16 %v3321_v2, %v3313_v25  ;;  %v1752_v57 = vpack.c.bf16 %v1332_v21, %v3454_v27  ;;  %v3469_v35 = vcvt.s32.f32 %v897_v52  ;;  %v602_v63 = vld [vmem:[%s2914_s22 + $0x1a0] sm:$0xff]  ;;  %v661_v2 = vld [vmem:[%s2914_s22 + $0x378] sm:$0xff] }
  0xe4   : > { %v3471_v42 = vcvt.s32.f32 %v902_v48  ;;  %v817_v59 = vunpack.c.0.s8 %v3416_v0  ;;  %v1702_v22 = vpack.c.bf16 %v1232_v55, %v1227_v51  ;;  %v1636_v20 = vcvt.s32.f32 %v1136_v29  ;;  %v656_v55 = vld [vmem:[%s2914_s22 + $0x350] sm:$0xff] }
  0xe5   : > { %2073 = vmatpush.bf16.msra.mxu0 %v3768_v60  ;;  %v1641_v31 = vcvt.s32.f32 %v1141_v50  ;;  %v822_v25 = vunpack.c.1.s8 %v3416_v0  ;;  %v717_v8 = vunpack.c.0.s8 %v562_v4  ;;  %v722_v28 = vunpack.c.1.s8 %v562_v4 }
  0xe6   : > { %2046 = vmatpush.bf16.msra.mxu1 %v1721_v15  ;;  %v1787_v5 = vpack.c.bf16 %v3471_v42, %v3469_v35  ;;  %v1317_v34 = vcvt.s32.f32 %v817_v59  ;;  %2061 = vmatmul.bf16.vlgmr.msrb.gmra.mxu3 %v3231_v56  ;;  %v887_v58 = vunpack.c.2.s8 %v602_v63  ;;  %v892_v18 = vunpack.c.3.s8 %v602_v63  ;;  %v577_v35 = vld [vmem:[%s2914_s22 + $0xd8] sm:$0xff] }
  0xe7   : > { %2111 = vmatpush.bf16.msra.mxu3 %v1921_v43  ;;  %2085 = vmatpush.bf16.msra.mxu2 %v1841_v14  ;;  %v582_v43 = vld [vmem:[%s2914_s22 + $0x100] sm:$0xff]  ;;  %v1322_v11 = vcvt.s32.f32 %v822_v25  ;;  %v1217_v15 = vcvt.s32.f32 %v717_v8  ;;  %v1222_v62 = vcvt.s32.f32 %v722_v28  ;;  %v1126_v44 = vunpack.c.2.s8 %v661_v2  ;;  %v557_v14 = vld [vmem:[%s2914_s22 + $0x38] sm:$0xff] }
  0xe8   : > { %2074 = vmatmul.bf16.vlgmr.msra.gmra.mxu0 %v3233_v32  ;;  %v1131_v33 = vunpack.c.3.s8 %v661_v2  ;;  %v1387_v17 = vcvt.s32.f32 %v887_v58  ;;  %v1392_v36 = vcvt.s32.f32 %v892_v18  ;;  %v807_v30 = vunpack.c.2.s8 %v582_v43 }
  0xe9   : > { %2118 = vmatpush.bf16.msrb.mxu0 %v1712_v26  ;;  %v1906_v26 = vpack.c.bf16 %v1641_v31, %v1636_v20  ;;  %v1747_v0 = vpack.c.bf16 %v1322_v11, %v1317_v34  ;;  %v1697_v40 = vpack.c.bf16 %v1222_v62, %v1217_v15  ;;  %v1626_v12 = vcvt.s32.f32 %v1126_v44 }
  0xea   : > { %2047 = vmatpush.bf16.msra.mxu1 %v1716_v54  ;;  %v1631_v13 = vcvt.s32.f32 %v1131_v33  ;;  %v812_v1 = vunpack.c.3.s8 %v582_v43  ;;  %v1782_v4 = vpack.c.bf16 %v1392_v36, %v1387_v17  ;;  %v1307_v45 = vcvt.s32.f32 %v807_v30 }
  0xeb   : > { %2112 = vmatpush.bf16.msra.mxu3 %v1916_v39  ;;  %2086 = vmatpush.bf16.msra.mxu2 %v1836_v47  ;;  %v707_v41 = vunpack.c.2.s8 %v557_v14  ;;  %v712_v37 = vunpack.c.3.s8 %v557_v14  ;;  %v877_v39 = vunpack.c.0.s8 %v602_v63  ;;  %v1116_v7 = vunpack.c.0.s8 %v661_v2 }
  0xec   : > { %v1901_v16 = vpack.c.bf16 %v1631_v13, %v1626_v12  ;;  %v1312_v23 = vcvt.s32.f32 %v812_v1  ;;  %v1121_v24 = vunpack.c.1.s8 %v661_v2  ;;  %v797_v19 = vunpack.c.0.s8 %v582_v43 }
  0xed   : > { %2119 = vmatpush.bf16.msrb.mxu0 %v1707_v6  ;;  %v882_v6 = vunpack.c.1.s8 %v602_v63  ;;  %2048 = vmatmul.bf16.vlgmr.msra.gmra.mxu1 %v3769_v53  ;;  %v1207_v54 = vcvt.s32.f32 %v707_v41  ;;  %v1212_v47 = vcvt.s32.f32 %v712_v37  ;;  %v1377_v27 = vcvt.s32.f32 %v877_v39  ;;  %v592_v37 = vld [vmem:[%s2914_s22 + $0x150] sm:$0xff] }
  0xee   : > { %2092 = vmatpush.bf16.msrb.mxu1 %v1911_v3  ;;  %2087 = vmatmul.bf16.vlgmr.msra.gmra.mxu2 %v3330_v46  ;;  %v597_v3 = vld [vmem:[%s2914_s22 + $0x178] sm:$0xff]  ;;  %v1616_v52 = vcvt.s32.f32 %v1116_v7  ;;  %v1621_v48 = vcvt.s32.f32 %v1121_v24  ;;  %v802_v51 = vunpack.c.1.s8 %v582_v43  ;;  %v1297_v50 = vcvt.s32.f32 %v797_v19 }
  0xef   : > { %2144 = vmatpush.bf16.msrb.mxu3 %v1792_v49  ;;  %2131 = vmatpush.bf16.msrb.mxu2 %v1752_v57  ;;  %v1742_v49 = vpack.c.bf16 %v1312_v23, %v1307_v45  ;;  %v1382_v9 = vcvt.s32.f32 %v882_v6  ;;  %v1692_v21 = vpack.c.bf16 %v1212_v47, %v1207_v54  ;;  %v697_v60 = vunpack.c.0.s8 %v557_v14  ;;  %v647_v54 = vld [vmem:[%s2914_s22 + $0x308] sm:$0xff] }
  0xf0   : > { %v702_v57 = vunpack.c.1.s8 %v557_v14  ;;  %v1896_v42 = vpack.c.bf16 %v1621_v48, %v1616_v52  ;;  %v1302_v59 = vcvt.s32.f32 %v802_v51  ;;  %v867_v63 = vunpack.c.2.s8 %v597_v3 }
  0xf1   : > { %2120 = vmatpush.bf16.msrb.mxu0 %v1702_v22  ;;  %v1777_v29 = vpack.c.bf16 %v1382_v9, %v1377_v27  ;;  %v872_v22 = vunpack.c.3.s8 %v597_v3  ;;  %v1197_v20 = vcvt.s32.f32 %v697_v60  ;;  %v1106_v25 = vunpack.c.2.s8 %v656_v55  ;;  %v651_v27 = vld [vmem:[%s2914_s22 + $0x328] sm:$0xff] }
  0xf2   : > { %2093 = vmatpush.bf16.msrb.mxu1 %v1906_v26  ;;  %v1202_v31 = vcvt.s32.f32 %v702_v57  ;;  %v1111_v2 = vunpack.c.3.s8 %v656_v55  ;;  %v1737_v34 = vpack.c.bf16 %v1302_v59, %v1297_v50  ;;  %v1367_v8 = vcvt.s32.f32 %v867_v63 }
  0xf3   : > { %2145 = vmatpush.bf16.msrb.mxu3 %v1787_v5  ;;  %2132 = vmatpush.bf16.msrb.mxu2 %v1747_v0  ;;  %v552_v5 = vld [vmem:[%s2914_s22 + $0x10] sm:$0xff]  ;;  %v1372_v28 = vcvt.s32.f32 %v872_v22  ;;  %v787_v43 = vunpack.c.2.s8 %v577_v35  ;;  %v1606_v11 = vcvt.s32.f32 %v1106_v25  ;;  %v792_v18 = vunpack.c.3.s8 %v577_v35 }
  0xf4   : > { %v1687_v26 = vpack.c.bf16 %v1202_v31, %v1197_v20  ;;  %v1611_v58 = vcvt.s32.f32 %v1111_v2  ;;  %v687_v44 = vunpack.c.2.s8 %v552_v5  ;;  %v692_v33 = vunpack.c.3.s8 %v552_v5 }
  0xf5   : > { %2121 = vmatpush.bf16.msrb.mxu0 %v1697_v40  ;;  %v1772_v15 = vpack.c.bf16 %v1372_v28, %v1367_v8  ;;  %v1287_v62 = vcvt.s32.f32 %v787_v43  ;;  %v1292_v0 = vcvt.s32.f32 %v792_v18  ;;  %v857_v17 = vunpack.c.0.s8 %v597_v3 }
  0xf6   : > { %2094 = vmatpush.bf16.msrb.mxu1 %v1901_v16  ;;  %v1891_v14 = vpack.c.bf16 %v1611_v58, %v1606_v11  ;;  %v862_v36 = vunpack.c.1.s8 %v597_v3  ;;  %v1187_v30 = vcvt.s32.f32 %v687_v44  ;;  %v1192_v40 = vcvt.s32.f32 %v692_v33  ;;  %2670 = vmatmul.msk.bf16.vlgmr.msra.gmra.mxu3 %vm1932_vm2, %v3395_v10  ;;  %v672_v33 = vld [vmem:[%s2914_s22 + $0x3d0] sm:$0xff] }
  0xf7   : > { %2146 = vmatpush.bf16.msrb.mxu3 %v1782_v4  ;;  %2133 = vmatpush.bf16.msrb.mxu2 %v1742_v49  ;;  %v1096_v12 = vunpack.c.0.s8 %v656_v55  ;;  %v1101_v13 = vunpack.c.1.s8 %v656_v55  ;;  %v1732_v1 = vpack.c.bf16 %v1292_v0, %v1287_v62  ;;  %v1357_v4 = vcvt.s32.f32 %v857_v17 }
  0xf8   : > { %v1362_v45 = vcvt.s32.f32 %v862_v36  ;;  %v777_v41 = vunpack.c.0.s8 %v577_v35  ;;  %v1682_v16 = vpack.c.bf16 %v1192_v40, %v1187_v30  ;;  %v782_v6 = vunpack.c.1.s8 %v577_v35  ;;  %v627_v30 = vld [vmem:[%s2914_s22 + $0x268] sm:$0xff] }
  0xf9   : > { %2122 = vmatpush.bf16.msrb.mxu0 %v1692_v21  ;;  %v1596_v23 = vcvt.s32.f32 %v1096_v12  ;;  %v1601_v39 = vcvt.s32.f32 %v1101_v13  ;;  %v677_v24 = vunpack.c.0.s8 %v552_v5  ;;  %v682_v49 = vunpack.c.1.s8 %v552_v5 }
  0xfa   : > { %2095 = vmatpush.bf16.msrb.mxu1 %v1896_v42  ;;  %v1767_v47 = vpack.c.bf16 %v1362_v45, %v1357_v4  ;;  %v1277_v7 = vcvt.s32.f32 %v777_v41  ;;  %v1282_v19 = vcvt.s32.f32 %v782_v6  ;;  %v847_v3 = vunpack.c.2.s8 %v592_v37  ;;  %v667_v4 = vld [vmem:[%s2914_s22 + $0x3a8] sm:$0xff] }
  0xfb   : > { %2147 = vmatpush.bf16.msrb.mxu3 %v1777_v29  ;;  %2134 = vmatpush.bf16.msrb.mxu2 %v1737_v34  ;;  %v1886_v9 = vpack.c.bf16 %v1601_v39, %v1596_v23  ;;  %v852_v21 = vunpack.c.3.s8 %v592_v37  ;;  %v1177_v52 = vcvt.s32.f32 %v677_v24  ;;  %v1182_v48 = vcvt.s32.f32 %v682_v49  ;;  %v572_v29 = vld [vmem:[%s2914_s22 + $0xb0] sm:$0xff] }
  0xfc   : > { %v1067_v51 = vunpack.c.2.s8 %v647_v54  ;;  %v1072_v55 = vunpack.c.3.s8 %v647_v54  ;;  %v1727_v50 = vpack.c.bf16 %v1282_v19, %v1277_v7  ;;  %v1347_v60 = vcvt.s32.f32 %v847_v3 }
  0xfd   : > { %2123 = vmatpush.bf16.msrb.mxu0 %v1687_v26  ;;  %v1352_v57 = vcvt.s32.f32 %v852_v21  ;;  %v1086_v35 = vunpack.c.2.s8 %v651_v27  ;;  %v1677_v42 = vpack.c.bf16 %v1182_v48, %v1177_v52  ;;  %v1091_v22 = vunpack.c.3.s8 %v651_v27 }
  0xfe   : > { %2096 = vmatpush.bf16.msrb.mxu1 %v1891_v14  ;;  %v1567_v59 = vcvt.s32.f32 %v1067_v51  ;;  %v1572_v63 = vcvt.s32.f32 %v1072_v55  ;;  %v767_v25 = vunpack.c.2.s8 %v572_v29  ;;  %v772_v2 = vunpack.c.3.s8 %v572_v29 }
  0xff   : > { %2148 = vmatpush.bf16.msrb.mxu3 %v1772_v15  ;;  %2135 = vmatpush.bf16.msrb.mxu2 %v1732_v1  ;;  %v1762_v20 = vpack.c.bf16 %v1352_v57, %v1347_v60  ;;  %v1586_v31 = vcvt.s32.f32 %v1086_v35  ;;  %v1591_v34 = vcvt.s32.f32 %v1091_v22  ;;  %v837_v8 = vunpack.c.0.s8 %v592_v37  ;;  %v588_v22 = vld [vmem:[%s2914_s22 + $0x130] sm:$0xff] }
 0x100   : > { %v1872_v5 = vpack.c.bf16 %v1572_v63, %v1567_v59  ;;  %v842_v28 = vunpack.c.1.s8 %v592_v37  ;;  %v1267_v43 = vcvt.s32.f32 %v767_v25  ;;  %v1272_v26 = vcvt.s32.f32 %v772_v2 }
 0x101   : > { %2124 = vmatpush.bf16.msrb.mxu0 %v1682_v16  ;;  %v1057_v11 = vunpack.c.0.s8 %v647_v54  ;;  %v1062_v58 = vunpack.c.1.s8 %v647_v54  ;;  %v1881_v18 = vpack.c.bf16 %v1591_v34, %v1586_v31  ;;  %v1337_v15 = vcvt.s32.f32 %v837_v8 }
 0x102   : > { %2097 = vmatpush.bf16.msrb.mxu1 %v1886_v9  ;;  %v1342_v62 = vcvt.s32.f32 %v842_v28  ;;  %v1076_v44 = vunpack.c.0.s8 %v651_v27  ;;  %v1722_v14 = vpack.c.bf16 %v1272_v26, %v1267_v43  ;;  %v1081_v36 = vunpack.c.1.s8 %v651_v27  ;;  %v622_v43 = vld [vmem:[%s2914_s22 + $0x240] sm:$0xff] }
 0x103   : > { %2149 = vmatpush.bf16.msrb.mxu3 %v1767_v47  ;;  %2136 = vmatpush.bf16.msrb.mxu2 %v1727_v50  ;;  %v1557_v0 = vcvt.s32.f32 %v1057_v11  ;;  %v1562_v17 = vcvt.s32.f32 %v1062_v58  ;;  %v757_v13 = vunpack.c.0.s8 %v572_v29  ;;  %v762_v1 = vunpack.c.1.s8 %v572_v29  ;;  %v642_v47 = vld [vmem:[%s2914_s22 + $0x2e0] sm:$0xff] }
 0x104   : > { %v1757_v40 = vpack.c.bf16 %v1342_v62, %v1337_v15  ;;  %v1576_v12 = vcvt.s32.f32 %v1076_v44  ;;  %v1581_v41 = vcvt.s32.f32 %v1081_v36  ;;  %v1167_v37 = vunpack.c.2.s8 %v672_v33  ;;  %v662_v15 = vld [vmem:[%s2914_s22 + $0x380] sm:$0xff] }
 0x105   : > { %2125 = vmatpush.bf16.msrb.mxu0 %v1677_v42  ;;  %v1867_v45 = vpack.c.bf16 %v1562_v17, %v1557_v0  ;;  %v1172_v16 = vunpack.c.3.s8 %v672_v33  ;;  %v1257_v23 = vcvt.s32.f32 %v757_v13  ;;  %v1262_v39 = vcvt.s32.f32 %v762_v1 }
 0x106   : > { %2098 = vmatpush.bf16.msrb.mxu1 %v1881_v18  ;;  %v987_v6 = vunpack.c.2.s8 %v627_v30  ;;  %v992_v54 = vunpack.c.3.s8 %v627_v30  ;;  %v1876_v7 = vpack.c.bf16 %v1581_v41, %v1576_v12  ;;  %v1667_v24 = vcvt.s32.f32 %v1167_v37 }
 0x107   : > { %2150 = vmatpush.bf16.msrb.mxu3 %v1762_v20  ;;  %2137 = vmatpush.bf16.msrb.mxu2 %v1722_v14  ;;  %v1672_v49 = vcvt.s32.f32 %v1172_v16  ;;  %v1147_v27 = vunpack.c.2.s8 %v667_v4  ;;  %v1717_v9 = vpack.c.bf16 %v1262_v39, %v1257_v23  ;;  %v1152_v21 = vunpack.c.3.s8 %v667_v4 }
 0x108   : > { %2126 = vmatmul.bf16.vlgmr.msrb.gmra.mxu0 %v3179_v61  ;;  %v1487_v19 = vcvt.s32.f32 %v987_v6  ;;  %v1492_v3 = vcvt.s32.f32 %v992_v54  ;;  %v1047_v51 = vunpack.c.2.s8 %v642_v47  ;;  %v1052_v55 = vunpack.c.3.s8 %v642_v47 }
 0x109   : > { %2170 = vmatpush.bf16.msra.mxu0 %v1872_v5  ;;  %v1922_v52 = vpack.c.bf16 %v1672_v49, %v1667_v24  ;;  %v1647_v48 = vcvt.s32.f32 %v1147_v27  ;;  %v1652_v50 = vcvt.s32.f32 %v1152_v21  ;;  %v1157_v60 = vunpack.c.0.s8 %v672_v33  ;;  %v583_v21 = vld [vmem:[%s2914_s22 + $0x108] sm:$0xff] }
 0x10a   : > { %2099 = vmatpush.bf16.msrb.mxu1 %v1876_v7  ;;  %v1832_v29 = vpack.c.bf16 %v1492_v3, %v1487_v19  ;;  %v1162_v57 = vunpack.c.1.s8 %v672_v33  ;;  %v1547_v35 = vcvt.s32.f32 %v1047_v51  ;;  %v1552_v42 = vcvt.s32.f32 %v1052_v55 }
 0x10b   : > { %2151 = vmatpush.bf16.msrb.mxu3 %v1757_v40  ;;  %2138 = vmatpush.bf16.msrb.mxu2 %v1717_v9  ;;  %v977_v59 = vunpack.c.0.s8 %v627_v30  ;;  %v982_v63 = vunpack.c.1.s8 %v627_v30  ;;  %v1912_v20 = vpack.c.bf16 %v1652_v50, %v1647_v48  ;;  %v1657_v31 = vcvt.s32.f32 %v1157_v60 }
 0x10c   : > { %v1662_v25 = vcvt.s32.f32 %v1162_v57  ;;  %v1137_v2 = vunpack.c.0.s8 %v667_v4  ;;  %v1862_v5 = vpack.c.bf16 %v1552_v42, %v1547_v35  ;;  %v1142_v28 = vunpack.c.1.s8 %v667_v4  ;;  %v637_v4 = vld [vmem:[%s2914_s22 + $0x2b8] sm:$0xff] }
 0x10d   : > { %2171 = vmatpush.bf16.msra.mxu0 %v1867_v45  ;;  %2100 = vmatmul.bf16.vlgmr.msrb.gmra.mxu1 %v3332_v38  ;;  %v1477_v34 = vcvt.s32.f32 %v977_v59  ;;  %v1482_v8 = vcvt.s32.f32 %v982_v63  ;;  %v828_v58 = vunpack.c.2.s8 %v588_v22  ;;  %v833_v18 = vunpack.c.3.s8 %v588_v22  ;;  %v617_v35 = vld [vmem:[%s2914_s22 + $0x218] sm:$0xff] }
 0x10e   : > { %2152 = vmatmul.bf16.vlgmr.msrb.gmra.mxu3 %v3231_v56  ;;  %2157 = vmatpush.bf16.msra.mxu1 %v1832_v29  ;;  %v1917_v26 = vpack.c.bf16 %v1662_v25, %v1657_v31  ;;  %v1637_v11 = vcvt.s32.f32 %v1137_v2  ;;  %v1642_v44 = vcvt.s32.f32 %v1142_v28  ;;  %v1037_v33 = vunpack.c.0.s8 %v642_v47 }
 0x10f   : > { %2202 = vmatpush.bf16.msra.mxu3 %v1922_v52  ;;  %2139 = vmatmul.bf16.vlgmr.msrb.gmra.mxu2 %v3769_v53  ;;  %v1827_v62 = vpack.c.bf16 %v1482_v8, %v1477_v34  ;;  %v1042_v14 = vunpack.c.1.s8 %v642_v47  ;;  %v1328_v0 = vcvt.s32.f32 %v828_v58  ;;  %v1333_v17 = vcvt.s32.f32 %v833_v18 }
 0x110   : > { %2183 = vmatpush.bf16.msra.mxu2 %v1912_v20  ;;  %v967_v36 = vunpack.c.2.s8 %v622_v43  ;;  %v972_v30 = vunpack.c.3.s8 %v622_v43  ;;  %v1907_v40 = vpack.c.bf16 %v1642_v44, %v1637_v11  ;;  %v1537_v12 = vcvt.s32.f32 %v1037_v33  ;;  %v657_v20 = vld [vmem:[%s2914_s22 + $0x358] sm:$0xff] }
 0x111   : > { %2172 = vmatpush.bf16.msra.mxu0 %v1862_v5  ;;  %v1542_v13 = vcvt.s32.f32 %v1042_v14  ;;  %v1127_v1 = vunpack.c.2.s8 %v662_v15  ;;  %v1753_v45 = vpack.c.bf16 %v1333_v17, %v1328_v0  ;;  %v1132_v16 = vunpack.c.3.s8 %v662_v15 }
 0x112   : > { %2158 = vmatpush.bf16.msra.mxu1 %v1827_v62  ;;  %v1467_v41 = vcvt.s32.f32 %v967_v36  ;;  %v1472_v37 = vcvt.s32.f32 %v972_v30  ;;  %v818_v6 = vunpack.c.0.s8 %v588_v22  ;;  %v823_v54 = vunpack.c.1.s8 %v588_v22 }
 0x113   : > { %2203 = vmatpush.bf16.msra.mxu3 %v1917_v26  ;;  %v1857_v23 = vpack.c.bf16 %v1542_v13, %v1537_v12  ;;  %v1627_v39 = vcvt.s32.f32 %v1127_v1  ;;  %v1632_v7 = vcvt.s32.f32 %v1132_v16  ;;  %v1027_v24 = vunpack.c.2.s8 %v637_v4  ;;  %v578_v16 = vld [vmem:[%s2914_s22 + $0xe0] sm:$0xff] }
 0x114   : > { %2184 = vmatpush.bf16.msra.mxu2 %v1907_v40  ;;  %v1822_v47 = vpack.c.bf16 %v1472_v37, %v1467_v41  ;;  %v1032_v49 = vunpack.c.3.s8 %v637_v4  ;;  %v1318_v27 = vcvt.s32.f32 %v818_v6  ;;  %v1323_v9 = vcvt.s32.f32 %v823_v54 }
 0x115   : > { %2173 = vmatpush.bf16.msra.mxu0 %v1857_v23  ;;  %v957_v19 = vunpack.c.0.s8 %v622_v43  ;;  %v962_v3 = vunpack.c.1.s8 %v622_v43  ;;  %v1902_v52 = vpack.c.bf16 %v1632_v7, %v1627_v39  ;;  %v1527_v48 = vcvt.s32.f32 %v1027_v24 }
 0x116   : > { %2159 = vmatpush.bf16.msra.mxu1 %v1822_v47  ;;  %v1532_v51 = vcvt.s32.f32 %v1032_v49  ;;  %v1117_v55 = vunpack.c.0.s8 %v662_v15  ;;  %v1748_v29 = vpack.c.bf16 %v1323_v9, %v1318_v27  ;;  %v1122_v57 = vunpack.c.1.s8 %v662_v15  ;;  %v632_v15 = vld [vmem:[%s2914_s22 + $0x290] sm:$0xff] }
 0x117   : > { %2222 = vmatpush.bf16.msrb.mxu3 %v1753_v45  ;;  %v1457_v50 = vcvt.s32.f32 %v957_v19  ;;  %v1462_v60 = vcvt.s32.f32 %v962_v3  ;;  %v808_v63 = vunpack.c.2.s8 %v583_v21  ;;  %v813_v22 = vunpack.c.3.s8 %v583_v21  ;;  %v608_v27 = vld [vmem:[%s2914_s22 + $0x1d0] sm:$0xff] }
 0x118   : > { %2185 = vmatpush.bf16.msra.mxu2 %v1902_v52  ;;  %v1852_v42 = vpack.c.bf16 %v1532_v51, %v1527_v48  ;;  %v1617_v59 = vcvt.s32.f32 %v1117_v55  ;;  %v1622_v25 = vcvt.s32.f32 %v1122_v57  ;;  %v1017_v2 = vunpack.c.0.s8 %v637_v4  ;;  %v612_v52 = vld [vmem:[%s2914_s22 + $0x1f0] sm:$0xff] }
 0x119   : > { %v1817_v31 = vpack.c.bf16 %v1462_v60, %v1457_v50  ;;  %v1022_v5 = vunpack.c.1.s8 %v637_v4  ;;  %v1308_v34 = vcvt.s32.f32 %v808_v63  ;;  %v1313_v8 = vcvt.s32.f32 %v813_v22 }
 0x11a   : > { %2174 = vmatpush.bf16.msra.mxu0 %v1852_v42  ;;  %v947_v28 = vunpack.c.2.s8 %v617_v35  ;;  %v952_v43 = vunpack.c.3.s8 %v617_v35  ;;  %v1897_v26 = vpack.c.bf16 %v1622_v25, %v1617_v59  ;;  %v1517_v11 = vcvt.s32.f32 %v1017_v2  ;;  %v652_v42 = vld [vmem:[%s2914_s22 + $0x330] sm:$0xff] }
 0x11b   : > { %2223 = vmatpush.bf16.msrb.mxu3 %v1748_v29  ;;  %2160 = vmatpush.bf16.msra.mxu1 %v1817_v31  ;;  %v1522_v58 = vcvt.s32.f32 %v1022_v5  ;;  %v1107_v18 = vunpack.c.2.s8 %v657_v20  ;;  %v1743_v62 = vpack.c.bf16 %v1313_v8, %v1308_v34  ;;  %v1112_v14 = vunpack.c.3.s8 %v657_v20 }
 0x11c   : > { %v1447_v44 = vcvt.s32.f32 %v947_v28  ;;  %v1452_v33 = vcvt.s32.f32 %v952_v43  ;;  %2186 = vmatpush.bf16.msra.mxu2 %v1897_v26  ;;  %v798_v36 = vunpack.c.0.s8 %v583_v21  ;;  %v803_v30 = vunpack.c.1.s8 %v583_v21 }
 0x11d   : > { %v1847_v0 = vpack.c.bf16 %v1522_v58, %v1517_v11  ;;  %v1607_v17 = vcvt.s32.f32 %v1107_v18  ;;  %v1612_v12 = vcvt.s32.f32 %v1112_v14  ;;  %v1007_v13 = vunpack.c.2.s8 %v632_v15 }
 0x11e   : > { %2671 = vmatmul.msk.bf16.vlgmr.msra.gmra.mxu3 %vm1932_vm2, %v3395_v10  ;;  %v1812_v40 = vpack.c.bf16 %v1452_v33, %v1447_v44  ;;  %v1012_v1 = vunpack.c.3.s8 %v632_v15  ;;  %v1298_v4 = vcvt.s32.f32 %v798_v36  ;;  %v1303_v45 = vcvt.s32.f32 %v803_v30  ;;  %v573_v30 = vld [vmem:[%s2914_s22 + $0xb8] sm:$0xff] }
 0x11f   : > { %2224 = vmatpush.bf16.msrb.mxu3 %v1743_v62  ;;  %2175 = vmatpush.bf16.msra.mxu0 %v1847_v0  ;;  %v937_v41 = vunpack.c.0.s8 %v617_v35  ;;  %v942_v37 = vunpack.c.1.s8 %v617_v35  ;;  %v1892_v23 = vpack.c.bf16 %v1612_v12, %v1607_v17  ;;  %v1507_v39 = vcvt.s32.f32 %v1007_v13 }
 0x120   : > { %2161 = vmatpush.bf16.msra.mxu1 %v1812_v40  ;;  %v1512_v6 = vcvt.s32.f32 %v1012_v1  ;;  %v1097_v54 = vunpack.c.0.s8 %v657_v20  ;;  %v1738_v47 = vpack.c.bf16 %v1303_v45, %v1298_v4  ;;  %v1102_v49 = vunpack.c.1.s8 %v657_v20  ;;  %v568_v4 = vld [vmem:[%s2914_s22 + $0x90] sm:$0xff] }
 0x121   : > { %v1437_v7 = vcvt.s32.f32 %v937_v41  ;;  %v1442_v24 = vcvt.s32.f32 %v942_v37  ;;  %2187 = vmatpush.bf16.msra.mxu2 %v1892_v23  ;;  %v788_v3 = vunpack.c.2.s8 %v578_v16  ;;  %v793_v21 = vunpack.c.3.s8 %v578_v16  ;;  %v628_v23 = vld [vmem:[%s2914_s22 + $0x270] sm:$0xff] }
 0x122   : > { %v1842_v9 = vpack.c.bf16 %v1512_v6, %v1507_v39  ;;  %v1597_v19 = vcvt.s32.f32 %v1097_v54  ;;  %v1602_v51 = vcvt.s32.f32 %v1102_v49  ;;  %v997_v55 = vunpack.c.0.s8 %v632_v15 }
 0x123   : > { %2225 = vmatpush.bf16.msrb.mxu3 %v1738_v47  ;;  %v1807_v48 = vpack.c.bf16 %v1442_v24, %v1437_v7  ;;  %v1002_v29 = vunpack.c.1.s8 %v632_v15  ;;  %v1288_v50 = vcvt.s32.f32 %v788_v3  ;;  %v1293_v60 = vcvt.s32.f32 %v793_v21 }
 0x124   : > { %2176 = vmatpush.bf16.msra.mxu0 %v1842_v9  ;;  %v908_v57 = vunpack.c.2.s8 %v608_v27  ;;  %v913_v35 = vunpack.c.3.s8 %v608_v27  ;;  %v1887_v59 = vpack.c.bf16 %v1602_v51, %v1597_v19  ;;  %v1497_v63 = vcvt.s32.f32 %v997_v55  ;;  %v603_v9 = vld [vmem:[%s2914_s22 + $0x1a8] sm:$0xff] }
 0x125   : > { %2162 = vmatpush.bf16.msra.mxu1 %v1807_v48  ;;  %v1502_v22 = vcvt.s32.f32 %v1002_v29  ;;  %v927_v20 = vunpack.c.2.s8 %v612_v52  ;;  %v1733_v31 = vpack.c.bf16 %v1293_v60, %v1288_v50  ;;  %v932_v5 = vunpack.c.3.s8 %v612_v52 }
 0x126   : > { %v1408_v25 = vcvt.s32.f32 %v908_v57  ;;  %v1413_v2 = vcvt.s32.f32 %v913_v35  ;;  %2188 = vmatpush.bf16.msra.mxu2 %v1887_v59  ;;  %v1087_v28 = vunpack.c.2.s8 %v652_v42  ;;  %v1092_v43 = vunpack.c.3.s8 %v652_v42 }
 0x127   : > { %v1837_v34 = vpack.c.bf16 %v1502_v22, %v1497_v63  ;;  %v1427_v8 = vcvt.s32.f32 %v927_v20  ;;  %2226 = vmatpush.bf16.msrb.mxu3 %v1733_v31  ;;  %v1432_v11 = vcvt.s32.f32 %v932_v5  ;;  %v778_v58 = vunpack.c.0.s8 %v578_v16  ;;  %v668_v5 = vld [vmem:[%s2914_s22 + $0x3b0] sm:$0xff] }
 0x128   : > { %v1793_v26 = vpack.c.bf16 %v1413_v2, %v1408_v25  ;;  %v783_v18 = vunpack.c.1.s8 %v578_v16  ;;  %v1587_v15 = vcvt.s32.f32 %v1087_v28  ;;  %v1592_v62 = vcvt.s32.f32 %v1092_v43 }
 0x129   : > { %2177 = vmatpush.bf16.msra.mxu0 %v1837_v34  ;;  %v898_v44 = vunpack.c.0.s8 %v608_v27  ;;  %v903_v33 = vunpack.c.1.s8 %v608_v27  ;;  %v1802_v14 = vpack.c.bf16 %v1432_v11, %v1427_v8  ;;  %v1278_v0 = vcvt.s32.f32 %v778_v58 }
 0x12a   : > { %v1283_v17 = vcvt.s32.f32 %v783_v18  ;;  %v917_v36 = vunpack.c.0.s8 %v612_v52  ;;  %v1882_v40 = vpack.c.bf16 %v1592_v62, %v1587_v15  ;;  %v922_v1 = vunpack.c.1.s8 %v612_v52  ;;  %v563_v15 = vld [vmem:[%s2914_s22 + $0x68] sm:$0xff] }
 0x12b   : > { %v1398_v12 = vcvt.s32.f32 %v898_v44  ;;  %v1403_v13 = vcvt.s32.f32 %v903_v33  ;;  %2163 = vmatpush.bf16.msra.mxu1 %v1802_v14  ;;  %v1077_v37 = vunpack.c.0.s8 %v652_v42  ;;  %v1082_v16 = vunpack.c.1.s8 %v652_v42 }
 0x12c   : > { %v1728_v45 = vpack.c.bf16 %v1283_v17, %v1278_v0  ;;  %2178 = vmatmul.bf16.vlgmr.msra.gmra.mxu0 %v3330_v46  ;;  %v1417_v41 = vcvt.s32.f32 %v917_v36  ;;  %2189 = vmatpush.bf16.msra.mxu2 %v1882_v40  ;;  %v1422_v6 = vcvt.s32.f32 %v922_v1  ;;  %v768_v54 = vunpack.c.2.s8 %v573_v30  ;;  %v623_v0 = vld [vmem:[%s2914_s22 + $0x248] sm:$0xff] }
 0x12d   : > { %2235 = vmatpush.bf16.msrb.mxu0 %v1793_v26  ;;  %v1788_v39 = vpack.c.bf16 %v1403_v13, %v1398_v12  ;;  %v773_v47 = vunpack.c.3.s8 %v573_v30  ;;  %v1577_v7 = vcvt.s32.f32 %v1077_v37  ;;  %v1582_v24 = vcvt.s32.f32 %v1082_v16 }
 0x12e   : > { %2227 = vmatpush.bf16.msrb.mxu3 %v1728_v45  ;;  %v748_v49 = vunpack.c.2.s8 %v568_v4  ;;  %v753_v27 = vunpack.c.3.s8 %v568_v4  ;;  %v1797_v19 = vpack.c.bf16 %v1422_v6, %v1417_v41  ;;  %v1268_v3 = vcvt.s32.f32 %v768_v54 }
 0x12f   : > { %v1273_v21 = vcvt.s32.f32 %v773_v47  ;;  %v988_v52 = vunpack.c.2.s8 %v628_v23  ;;  %v1877_v48 = vpack.c.bf16 %v1582_v24, %v1577_v7  ;;  %v993_v29 = vunpack.c.3.s8 %v628_v23 }
 0x130   : > { %v1248_v51 = vcvt.s32.f32 %v748_v49  ;;  %v1253_v55 = vcvt.s32.f32 %v753_v27  ;;  %2164 = vmatpush.bf16.msra.mxu1 %v1797_v19  ;;  %v888_v57 = vunpack.c.2.s8 %v603_v9  ;;  %v893_v35 = vunpack.c.3.s8 %v603_v9 }
 0x131   : > { %2236 = vmatpush.bf16.msrb.mxu0 %v1788_v39  ;;  %v1723_v50 = vpack.c.bf16 %v1273_v21, %v1268_v3  ;;  %v1488_v60 = vcvt.s32.f32 %v988_v52  ;;  %2190 = vmatpush.bf16.msra.mxu2 %v1877_v48  ;;  %v1493_v59 = vcvt.s32.f32 %v993_v29  ;;  %v758_v63 = vunpack.c.0.s8 %v573_v30  ;;  %v663_v29 = vld [vmem:[%s2914_s22 + $0x388] sm:$0xff] }
 0x132   : > { %v1713_v42 = vpack.c.bf16 %v1253_v55, %v1248_v51  ;;  %v763_v22 = vunpack.c.1.s8 %v573_v30  ;;  %v1388_v20 = vcvt.s32.f32 %v888_v57  ;;  %v1393_v31 = vcvt.s32.f32 %v893_v35 }
 0x133   : > { %2228 = vmatpush.bf16.msrb.mxu3 %v1723_v50  ;;  %v738_v25 = vunpack.c.0.s8 %v568_v4  ;;  %v743_v2 = vunpack.c.1.s8 %v568_v4  ;;  %v1833_v34 = vpack.c.bf16 %v1493_v59, %v1488_v60  ;;  %v1258_v8 = vcvt.s32.f32 %v758_v63  ;;  %2165 = vmatmul.bf16.vlgmr.msra.gmra.mxu1 %v3233_v32 }
 0x134   : > { %2209 = vmatpush.bf16.msrb.mxu1 %v1713_v42  ;;  %v1263_v28 = vcvt.s32.f32 %v763_v22  ;;  %v978_v43 = vunpack.c.0.s8 %v628_v23  ;;  %2191 = vmatmul.bf16.vlgmr.msra.gmra.mxu2 %v3332_v38  ;;  %v1783_v26 = vpack.c.bf16 %v1393_v31, %v1388_v20  ;;  %v983_v18 = vunpack.c.1.s8 %v628_v23  ;;  %v598_v23 = vld [vmem:[%s2914_s22 + $0x180] sm:$0xff] }
 0x135   : > { %v1238_v11 = vcvt.s32.f32 %v738_v25  ;;  %v1243_v58 = vcvt.s32.f32 %v743_v2  ;;  %2248 = vmatpush.bf16.msrb.mxu2 %v1833_v34  ;;  %v1148_v33 = vunpack.c.2.s8 %v668_v5  ;;  %v1153_v14 = vunpack.c.3.s8 %v668_v5  ;;  %v558_v20 = vld [vmem:[%s2914_s22 + $0x40] sm:$0xff] }
 0x136   : > { %v1718_v62 = vpack.c.bf16 %v1263_v28, %v1258_v8  ;;  %v1478_v44 = vcvt.s32.f32 %v978_v43  ;;  %2237 = vmatpush.bf16.msrb.mxu0 %v1783_v26  ;;  %v1483_v36 = vcvt.s32.f32 %v983_v18  ;;  %v878_v30 = vunpack.c.0.s8 %v603_v9  ;;  %v618_v34 = vld [vmem:[%s2914_s22 + $0x220] sm:$0xff] }
 0x137   : > { %v1708_v17 = vpack.c.bf16 %v1243_v58, %v1238_v11  ;;  %v883_v40 = vunpack.c.1.s8 %v603_v9  ;;  %v1648_v12 = vcvt.s32.f32 %v1148_v33  ;;  %v1653_v13 = vcvt.s32.f32 %v1153_v14 }
 0x138   : > { %2229 = vmatpush.bf16.msrb.mxu3 %v1718_v62  ;;  %v728_v1 = vunpack.c.2.s8 %v563_v15  ;;  %v733_v4 = vunpack.c.3.s8 %v563_v15  ;;  %v1828_v45 = vpack.c.bf16 %v1483_v36, %v1478_v44  ;;  %v1378_v41 = vcvt.s32.f32 %v878_v30 }
 0x139   : > { %2210 = vmatpush.bf16.msrb.mxu1 %v1708_v17  ;;  %v1383_v37 = vcvt.s32.f32 %v883_v40  ;;  %v968_v16 = vunpack.c.2.s8 %v623_v0  ;;  %v1913_v39 = vpack.c.bf16 %v1653_v13, %v1648_v12  ;;  %v973_v47 = vunpack.c.3.s8 %v623_v0 }
 0x13a   : > { %v1228_v6 = vcvt.s32.f32 %v728_v1  ;;  %v1233_v54 = vcvt.s32.f32 %v733_v4  ;;  %2249 = vmatpush.bf16.msrb.mxu2 %v1828_v45  ;;  %v1138_v49 = vunpack.c.0.s8 %v668_v5  ;;  %v1143_v27 = vunpack.c.1.s8 %v668_v5 }
 0x13b   : > { %2230 = vmatmul.bf16.vlgmr.msrb.gmra.mxu3 %v3769_v53  ;;  %v1778_v7 = vpack.c.bf16 %v1383_v37, %v1378_v41  ;;  %v1468_v24 = vcvt.s32.f32 %v968_v16  ;;  %v1473_v19 = vcvt.s32.f32 %v973_v47  ;;  %v868_v3 = vunpack.c.2.s8 %v598_v23 }
 0x13c   : > { %2274 = vmatpush.bf16.msra.mxu3 %v1913_v39  ;;  %v1703_v9 = vpack.c.bf16 %v1233_v54, %v1228_v6  ;;  %v873_v21 = vunpack.c.3.s8 %v598_v23  ;;  %v1638_v52 = vcvt.s32.f32 %v1138_v49  ;;  %v1643_v48 = vcvt.s32.f32 %v1143_v27 }
 0x13d   : > { %2238 = vmatpush.bf16.msrb.mxu0 %v1778_v7  ;;  %v718_v51 = vunpack.c.0.s8 %v563_v15  ;;  %v723_v55 = vunpack.c.1.s8 %v563_v15  ;;  %v1823_v50 = vpack.c.bf16 %v1473_v19, %v1468_v24  ;;  %v1368_v60 = vcvt.s32.f32 %v868_v3  ;;  %v658_v7 = vld [vmem:[%s2914_s22 + $0x360] sm:$0xff] }
 0x13e   : > { %2211 = vmatpush.bf16.msrb.mxu1 %v1703_v9  ;;  %v1373_v57 = vcvt.s32.f32 %v873_v21  ;;  %v958_v35 = vunpack.c.0.s8 %v623_v0  ;;  %v1908_v42 = vpack.c.bf16 %v1643_v48, %v1638_v52  ;;  %v963_v22 = vunpack.c.1.s8 %v623_v0  ;;  %v593_v0 = vld [vmem:[%s2914_s22 + $0x158] sm:$0xff] }
 0x13f   : > { %v1218_v59 = vcvt.s32.f32 %v718_v51  ;;  %v1223_v63 = vcvt.s32.f32 %v723_v55  ;;  %2250 = vmatpush.bf16.msrb.mxu2 %v1823_v50  ;;  %v1128_v2 = vunpack.c.2.s8 %v663_v29  ;;  %v1133_v5 = vunpack.c.3.s8 %v663_v29  ;;  %v3548_v17 = vpop.f32.mrf.mxu0  ;;  %v673_v48 = vld [vmem:[%s2914_s22 + $0x3d8] sm:$0xff] }
 0x140   : > { %v1773_v31 = vpack.c.bf16 %v1373_v57, %v1368_v60  ;;  %v1458_v25 = vcvt.s32.f32 %v958_v35  ;;  %2275 = vmatpush.bf16.msra.mxu3 %v1908_v42  ;;  %v1463_v28 = vcvt.s32.f32 %v963_v22  ;;  %v858_v43 = vunpack.c.0.s8 %v598_v23  ;;  %v553_v60 = vld [vmem:[%s2914_s22 + $0x18] sm:$0xff] }
 0x141   : > { %v1698_v8 = vpack.c.bf16 %v1223_v63, %v1218_v59  ;;  %v863_v26 = vunpack.c.1.s8 %v598_v23  ;;  %v1628_v11 = vcvt.s32.f32 %v1128_v2  ;;  %v1633_v58 = vcvt.s32.f32 %v1133_v5 }
 0x142   : > { %2239 = vmatpush.bf16.msrb.mxu0 %v1773_v31  ;;  %v708_v18 = vunpack.c.2.s8 %v558_v20  ;;  %v713_v15 = vunpack.c.3.s8 %v558_v20  ;;  %v1818_v62 = vpack.c.bf16 %v1463_v28, %v1458_v25  ;;  %v1358_v44 = vcvt.s32.f32 %v858_v43 }
 0x143   : > { %2212 = vmatpush.bf16.msrb.mxu1 %v1698_v8  ;;  %v1363_v33 = vcvt.s32.f32 %v863_v26  ;;  %v948_v14 = vunpack.c.2.s8 %v618_v34  ;;  %v1903_v36 = vpack.c.bf16 %v1633_v58, %v1628_v11  ;;  %v953_v12 = vunpack.c.3.s8 %v618_v34 }
 0x144   : > { %v1208_v30 = vcvt.s32.f32 %v708_v18  ;;  %v1213_v40 = vcvt.s32.f32 %v713_v15  ;;  %2251 = vmatpush.bf16.msrb.mxu2 %v1818_v62  ;;  %v1118_v4 = vunpack.c.0.s8 %v663_v29  ;;  %v1123_v45 = vunpack.c.1.s8 %v663_v29 }
 0x145   : > { %v1768_v13 = vpack.c.bf16 %v1363_v33, %v1358_v44  ;;  %v1448_v1 = vcvt.s32.f32 %v948_v14  ;;  %2276 = vmatpush.bf16.msra.mxu3 %v1903_v36  ;;  %v1453_v37 = vcvt.s32.f32 %v953_v12  ;;  %v848_v16 = vunpack.c.2.s8 %v593_v0  ;;  %v3553_v57 = vpop.f32.mrf.mxu3 }
 0x146   : > { %v1693_v41 = vpack.c.bf16 %v1213_v40, %v1208_v30  ;;  %v853_v23 = vunpack.c.3.s8 %v593_v0  ;;  %v1618_v39 = vcvt.s32.f32 %v1118_v4  ;;  %v1623_v6 = vcvt.s32.f32 %v1123_v45 }
 0x147   : > { %2240 = vmatpush.bf16.msrb.mxu0 %v1768_v13  ;;  %v698_v54 = vunpack.c.0.s8 %v558_v20  ;;  %v703_v47 = vunpack.c.1.s8 %v558_v20  ;;  %v1813_v24 = vpack.c.bf16 %v1453_v37, %v1448_v1  ;;  %v1348_v49 = vcvt.s32.f32 %v848_v16  ;;  %v3555_v35 = vpop.f32.mrf.mxu1  ;;  %v1960_v20 = vpop.f32.mrf.mxu0 }
 0x148   : > { %2213 = vmatpush.bf16.msrb.mxu1 %v1693_v41  ;;  %v1353_v27 = vcvt.s32.f32 %v853_v23  ;;  %v938_v9 = vunpack.c.0.s8 %v618_v34  ;;  %v1898_v19 = vpack.c.bf16 %v1623_v6, %v1618_v39  ;;  %v943_v52 = vunpack.c.1.s8 %v618_v34  ;;  %v613_v34 = vld [vmem:[%s2914_s22 + $0x1f8] sm:$0xff] }
 0x149   : > { %v1198_v3 = vcvt.s32.f32 %v698_v54  ;;  %v1203_v21 = vcvt.s32.f32 %v703_v47  ;;  %2252 = vmatpush.bf16.msrb.mxu2 %v1813_v24  ;;  %v1108_v29 = vunpack.c.2.s8 %v658_v7  ;;  %v1113_v50 = vunpack.c.3.s8 %v658_v7  ;;  %v653_v39 = vld [vmem:[%s2914_s22 + $0x338] sm:$0xff] }
 0x14a   : > { %v1763_v51 = vpack.c.bf16 %v1353_v27, %v1348_v49  ;;  %v1438_v55 = vcvt.s32.f32 %v938_v9  ;;  %2277 = vmatpush.bf16.msra.mxu3 %v1898_v19  ;;  %v1443_v59 = vcvt.s32.f32 %v943_v52  ;;  %v838_v63 = vunpack.c.0.s8 %v593_v0  ;;  %v589_v27 = vld [vmem:[%s2914_s22 + $0x138] sm:$0xff]  ;;  %v648_v52 = vld [vmem:[%s2914_s22 + $0x310] sm:$0xff] }
 0x14b   : > { %v1688_v42 = vpack.c.bf16 %v1203_v21, %v1198_v3  ;;  %v843_v22 = vunpack.c.1.s8 %v593_v0  ;;  %v1608_v31 = vcvt.s32.f32 %v1108_v29  ;;  %v1613_v25 = vcvt.s32.f32 %v1113_v50 }
 0x14c   : > { %2241 = vmatpush.bf16.msrb.mxu0 %v1763_v51  ;;  %v1168_v2 = vunpack.c.2.s8 %v673_v48  ;;  %v1173_v5 = vunpack.c.3.s8 %v673_v48  ;;  %v1808_v8 = vpack.c.bf16 %v1443_v59, %v1438_v55  ;;  %v1338_v28 = vcvt.s32.f32 %v838_v63 }
 0x14d   : > { %2214 = vmatpush.bf16.msrb.mxu1 %v1688_v42  ;;  %v1343_v43 = vcvt.s32.f32 %v843_v22  ;;  %v688_v26 = vunpack.c.2.s8 %v553_v60  ;;  %v1893_v11 = vpack.c.bf16 %v1613_v25, %v1608_v31  ;;  %v693_v15 = vunpack.c.3.s8 %v553_v60  ;;  %v3558_v12 = vpop.f32.mrf.mxu2  ;;  %v1947_v6 = vpop.f32.mrf.mxu3  ;;  %v569_v22 = vld [vmem:[%s2914_s22 + $0x98] sm:$0xff] }
 0x14e   : > { %v1668_v58 = vcvt.s32.f32 %v1168_v2  ;;  %v1673_v18 = vcvt.s32.f32 %v1173_v5  ;;  %2253 = vmatpush.bf16.msrb.mxu2 %v1808_v8  ;;  %v928_v33 = vunpack.c.2.s8 %v613_v34  ;;  %v933_v14 = vunpack.c.3.s8 %v613_v34 }
 0x14f   : > { %v1758_v62 = vpack.c.bf16 %v1343_v43, %v1338_v28  ;;  %v1188_v44 = vcvt.s32.f32 %v688_v26  ;;  %2278 = vmatpush.bf16.msra.mxu3 %v1893_v11  ;;  %v1193_v36 = vcvt.s32.f32 %v693_v15  ;;  %v1098_v30 = vunpack.c.0.s8 %v658_v7  ;;  %v1973_v54 = vpop.f32.mrf.mxu1 }
 0x150   : > { %v1923_v0 = vpack.c.bf16 %v1673_v18, %v1668_v58  ;;  %v1103_v40 = vunpack.c.1.s8 %v658_v7  ;;  %v1428_v13 = vcvt.s32.f32 %v928_v33  ;;  %v1433_v1 = vcvt.s32.f32 %v933_v14  ;;  %v3564_v50 = vpop.f32.mrf.mxu0 }
 0x151   : > { %2242 = vmatpush.bf16.msrb.mxu0 %v1758_v62  ;;  %v1158_v4 = vunpack.c.0.s8 %v673_v48  ;;  %v1163_v45 = vunpack.c.1.s8 %v673_v48  ;;  %v1683_v41 = vpack.c.bf16 %v1193_v36, %v1188_v44  ;;  %v1598_v37 = vcvt.s32.f32 %v1098_v30 }
 0x152   : > { %v1603_v16 = vcvt.s32.f32 %v1103_v40  ;;  %v678_v23 = vunpack.c.0.s8 %v553_v60  ;;  %v1803_v47 = vpack.c.bf16 %v1433_v1, %v1428_v13  ;;  %v683_v49 = vunpack.c.1.s8 %v553_v60 }
 0x153   : > { %v1658_v24 = vcvt.s32.f32 %v1158_v4  ;;  %v1663_v7 = vcvt.s32.f32 %v1163_v45  ;;  %2215 = vmatpush.bf16.msrb.mxu1 %v1683_v41  ;;  %v918_v3 = vunpack.c.0.s8 %v613_v34  ;;  %v923_v21 = vunpack.c.1.s8 %v613_v34  ;;  %v629_v45 = vld [vmem:[%s2914_s22 + $0x278] sm:$0xff] }
 0x154   : > { %v1888_v9 = vpack.c.bf16 %v1603_v16, %v1598_v37  ;;  %2243 = vmatmul.bf16.vlgmr.msrb.gmra.mxu0 %v3231_v56  ;;  %v1178_v19 = vcvt.s32.f32 %v678_v23  ;;  %2254 = vmatpush.bf16.msrb.mxu2 %v1803_v47  ;;  %v1183_v51 = vcvt.s32.f32 %v683_v49  ;;  %v1088_v55 = vunpack.c.2.s8 %v653_v39  ;;  %v3572_v49 = vld [vmem:[%s2914_s22 + $0x2e8] sm:$0xff] }
 0x155   : > { %2293 = vmatpush.bf16.msra.mxu0 %v1923_v0  ;;  %v1918_v48 = vpack.c.bf16 %v1663_v7, %v1658_v24  ;;  %v1093_v29 = vunpack.c.3.s8 %v653_v39  ;;  %v1418_v42 = vcvt.s32.f32 %v918_v3  ;;  %v1423_v60 = vcvt.s32.f32 %v923_v21  ;;  %v1986_v43 = vpop.f32.mrf.mxu2 }
 0x156   : > { %2279 = vmatpush.bf16.msra.mxu3 %v1888_v9  ;;  %v829_v59 = vunpack.c.2.s8 %v589_v27  ;;  %v834_v63 = vunpack.c.3.s8 %v589_v27  ;;  %v1678_v20 = vpack.c.bf16 %v1183_v51, %v1178_v19  ;;  %v1588_v31 = vcvt.s32.f32 %v1088_v55 }
 0x157   : > { %v1593_v25 = vcvt.s32.f32 %v1093_v29  ;;  %v1068_v2 = vunpack.c.2.s8 %v648_v52  ;;  %v1798_v5 = vpack.c.bf16 %v1423_v60, %v1418_v42  ;;  %v1073_v28 = vunpack.c.3.s8 %v648_v52  ;;  %v3574_v21 = vpop.f32.mrf.mxu3  ;;  %v564_v42 = vld [vmem:[%s2914_s22 + $0x70] sm:$0xff] }
 0x158   : > { %v1329_v34 = vcvt.s32.f32 %v829_v59  ;;  %v1334_v8 = vcvt.s32.f32 %v834_v63  ;;  %2216 = vmatpush.bf16.msrb.mxu1 %v1678_v20  ;;  %v749_v58 = vunpack.c.2.s8 %v569_v22  ;;  %v754_v18 = vunpack.c.3.s8 %v569_v22  ;;  %v2012_v6 = vpop.f32.mrf.mxu0 }
 0x159   : > { %2294 = vmatpush.bf16.msra.mxu0 %v1918_v48  ;;  %v1883_v26 = vpack.c.bf16 %v1593_v25, %v1588_v31  ;;  %v1568_v11 = vcvt.s32.f32 %v1068_v2  ;;  %2255 = vmatpush.bf16.msrb.mxu2 %v1798_v5  ;;  %v1573_v62 = vcvt.s32.f32 %v1073_v28  ;;  %v1078_v44 = vunpack.c.0.s8 %v653_v39  ;;  %v3576_v48 = vpop.f32.mrf.mxu1 }
 0x15a   : > { %v1754_v15 = vpack.c.bf16 %v1334_v8, %v1329_v34  ;;  %v1083_v33 = vunpack.c.1.s8 %v653_v39  ;;  %v1249_v14 = vcvt.s32.f32 %v749_v58  ;;  %v1254_v0 = vcvt.s32.f32 %v754_v18  ;;  %v584_v39 = vld [vmem:[%s2914_s22 + $0x110] sm:$0xff] }
 0x15b   : > { %2280 = vmatpush.bf16.msra.mxu3 %v1883_v26  ;;  %v819_v36 = vunpack.c.0.s8 %v589_v27  ;;  %v824_v30 = vunpack.c.1.s8 %v589_v27  ;;  %v1873_v40 = vpack.c.bf16 %v1573_v62, %v1568_v11  ;;  %2217 = vmatmul.bf16.vlgmr.msrb.gmra.mxu1 %v3179_v61  ;;  %v1578_v13 = vcvt.s32.f32 %v1078_v44 }
 0x15c   : > { %v1583_v1 = vcvt.s32.f32 %v1083_v33  ;;  %v1058_v4 = vunpack.c.0.s8 %v648_v52  ;;  %v1714_v41 = vpack.c.bf16 %v1254_v0, %v1249_v14  ;;  %2256 = vmatmul.bf16.vlgmr.msrb.gmra.mxu2 %v3233_v32  ;;  %v1063_v23 = vunpack.c.1.s8 %v648_v52 }
 0x15d   : > { %2313 = vmatpush.bf16.msrb.mxu0 %v1754_v15  ;;  %v1319_v37 = vcvt.s32.f32 %v819_v36  ;;  %v1324_v16 = vcvt.s32.f32 %v824_v30  ;;  %2261 = vmatpush.bf16.msra.mxu1 %v1873_v40  ;;  %v739_v24 = vunpack.c.0.s8 %v569_v22  ;;  %v744_v7 = vunpack.c.1.s8 %v569_v22  ;;  %v624_v30 = vld [vmem:[%s2914_s22 + $0x250] sm:$0xff] }
 0x15e   : > { %v1878_v54 = vpack.c.bf16 %v1583_v1, %v1578_v13  ;;  %v1558_v47 = vcvt.s32.f32 %v1058_v4  ;;  %2300 = vmatpush.bf16.msra.mxu2 %v1714_v41  ;;  %v1563_v9 = vcvt.s32.f32 %v1063_v23  ;;  %v989_v19 = vunpack.c.2.s8 %v629_v45  ;;  %v579_v23 = vld [vmem:[%s2914_s22 + $0xe8] sm:$0xff] }
 0x15f   : > { %v1749_v27 = vpack.c.bf16 %v1324_v16, %v1319_v37  ;;  %v994_v3 = vunpack.c.3.s8 %v629_v45  ;;  %v1239_v52 = vcvt.s32.f32 %v739_v24  ;;  %v1244_v51 = vcvt.s32.f32 %v744_v7  ;;  %v3591_v6 = vpop.f32.mrf.mxu2  ;;  %v638_v24 = vld [vmem:[%s2914_s22 + $0x2c0] sm:$0xff] }
 0x160   : > { %2281 = vmatpush.bf16.msra.mxu3 %v1878_v54  ;;  %v809_v55 = vunpack.c.2.s8 %v584_v39  ;;  %v814_v29 = vunpack.c.3.s8 %v584_v39  ;;  %v1868_v60 = vpack.c.bf16 %v1563_v9, %v1558_v47  ;;  %v1489_v59 = vcvt.s32.f32 %v989_v19 }
 0x161   : > { %2314 = vmatpush.bf16.msrb.mxu0 %v1749_v27  ;;  %v1494_v63 = vcvt.s32.f32 %v994_v3  ;;  %v1048_v22 = vunpack.c.2.s8 %v3572_v49  ;;  %v1709_v20 = vpack.c.bf16 %v1244_v51, %v1239_v52  ;;  %v1053_v2 = vunpack.c.3.s8 %v3572_v49  ;;  %v2025_v41 = vpop.f32.mrf.mxu1  ;;  %v559_v3 = vld [vmem:[%s2914_s22 + $0x48] sm:$0xff] }
 0x162   : > { %v1309_v31 = vcvt.s32.f32 %v809_v55  ;;  %v1314_v25 = vcvt.s32.f32 %v814_v29  ;;  %2262 = vmatpush.bf16.msra.mxu1 %v1868_v60  ;;  %v729_v8 = vunpack.c.2.s8 %v564_v42  ;;  %v734_v28 = vunpack.c.3.s8 %v564_v42 }
 0x163   : > { %v1834_v5 = vpack.c.bf16 %v1494_v63, %v1489_v59  ;;  %2282 = vmatmul.bf16.vlgmr.msra.gmra.mxu3 %v3332_v38  ;;  %v1548_v34 = vcvt.s32.f32 %v1048_v22  ;;  %2301 = vmatpush.bf16.msra.mxu2 %v1709_v20  ;;  %v1553_v26 = vcvt.s32.f32 %v1053_v2  ;;  %v979_v11 = vunpack.c.0.s8 %v629_v45 }
 0x164   : > { %v1744_v43 = vpack.c.bf16 %v1314_v25, %v1309_v31  ;;  %v984_v58 = vunpack.c.1.s8 %v629_v45  ;;  %2672 = vmatmul.msk.bf16.vlgmr.msra.gmra.mxu0 %vm1932_vm2, %v3395_v10  ;;  %v1229_v18 = vcvt.s32.f32 %v729_v8  ;;  %v1234_v15 = vcvt.s32.f32 %v734_v28  ;;  %v1999_v45 = vpop.f32.mrf.mxu3 }
 0x165   : > { %2339 = vmatpush.bf16.msrb.mxu3 %v1834_v5  ;;  %v1959_v62 = vadd.f32 %v3548_v17, %v3553_v57  ;;  %v799_v44 = vunpack.c.0.s8 %v584_v39  ;;  %v1863_v33 = vpack.c.bf16 %v1553_v26, %v1548_v34  ;;  %v1479_v14 = vcvt.s32.f32 %v979_v11  ;;  %v3599_v25 = vpop.f32.mrf.mxu0 }
 0x166   : > { %2315 = vmatpush.bf16.msrb.mxu0 %v1744_v43  ;;  %v1484_v0 = vcvt.s32.f32 %v984_v58  ;;  %v804_v36 = vunpack.c.1.s8 %v584_v39  ;;  %v1704_v40 = vpack.c.bf16 %v1234_v15, %v1229_v18  ;;  %v1038_v4 = vunpack.c.0.s8 %v3572_v49 }
 0x167   : > { %v1972_v13 = vadd.f32 %v3555_v35, %v1959_v62  ;;  %v1299_v1 = vcvt.s32.f32 %v799_v44  ;;  %2263 = vmatpush.bf16.msra.mxu1 %v1863_v33  ;;  %v1043_v57 = vunpack.c.1.s8 %v3572_v49  ;;  %v719_v16 = vunpack.c.0.s8 %v564_v42  ;;  %v619_v62 = vld [vmem:[%s2914_s22 + $0x228] sm:$0xff]  ;;  %v2038_v44 = vpop.f32.mrf.mxu2 }
 0x168   : > { %v1829_v37 = vpack.c.bf16 %v1484_v0, %v1479_v14  ;;  %v1304_v17 = vcvt.s32.f32 %v804_v36  ;;  %2302 = vmatpush.bf16.msra.mxu2 %v1704_v40  ;;  %v1538_v39 = vcvt.s32.f32 %v1038_v4  ;;  %v724_v54 = vunpack.c.1.s8 %v564_v42  ;;  %v574_v4 = vld [vmem:[%s2914_s22 + $0xc0] sm:$0xff] }
 0x169   : > { %v969_v35 = vunpack.c.2.s8 %v624_v30  ;;  %v974_v47 = vunpack.c.3.s8 %v624_v30  ;;  %v1543_v27 = vcvt.s32.f32 %v1043_v57  ;;  %v1219_v9 = vcvt.s32.f32 %v719_v16  ;;  %v633_v57 = vld [vmem:[%s2914_s22 + $0x298] sm:$0xff] }
 0x16a   : > { %2340 = vmatpush.bf16.msrb.mxu3 %v1829_v37  ;;  %v1739_v7 = vpack.c.bf16 %v1304_v17, %v1299_v1  ;;  %v3595_v19 = vadd.f32 %v3558_v12, %v1972_v13  ;;  %v1224_v49 = vcvt.s32.f32 %v724_v54  ;;  %v789_v55 = vunpack.c.2.s8 %v579_v23  ;;  %v3607_v16 = vpop.f32.mrf.mxu1 }
 0x16b   : > { %v1469_v52 = vcvt.s32.f32 %v969_v35  ;;  %v1474_v51 = vcvt.s32.f32 %v974_v47  ;;  %v1858_v29 = vpack.c.bf16 %v1543_v27, %v1538_v39  ;;  %v794_v60 = vunpack.c.3.s8 %v579_v23  ;;  %v2401_v39 = vld [vmem:[%s335_s16] sm:$0x1f]  ;;  %v3612_v27 = vld [vmem:[%s2914_s22 + $0x20] sm:$0xff] }
 0x16c   : > { %2316 = vmatpush.bf16.msrb.mxu0 %v1739_v7  ;;  %v1028_v42 = vunpack.c.2.s8 %v638_v24  ;;  %v1033_v59 = vunpack.c.3.s8 %v638_v24  ;;  %v1699_v63 = vpack.c.bf16 %v1224_v49, %v1219_v9  ;;  %v1289_v20 = vcvt.s32.f32 %v789_v55  ;;  %2403 = vst [vmem:[#allocation1] ss:$9 sm:$0xff] %v2401_v39 }
 0x16d   : > { %v1824_v22 = vpack.c.bf16 %v1474_v51, %v1469_v52  ;;  %v709_v31 = vunpack.c.2.s8 %v559_v3  ;;  %2264 = vmatpush.bf16.msra.mxu1 %v1858_v29  ;;  %v1294_v12 = vcvt.s32.f32 %v794_v60  ;;  %v714_v34 = vunpack.c.3.s8 %v559_v3  ;;  %v2077_v52 = vpop.f32.mrf.mxu0 }
 0x16e   : > { %v1528_v2 = vcvt.s32.f32 %v1028_v42  ;;  %v1533_v5 = vcvt.s32.f32 %v1033_v59  ;;  %2303 = vmatpush.bf16.msra.mxu2 %v1699_v63  ;;  %v959_v28 = vunpack.c.0.s8 %v624_v30  ;;  %v964_v43 = vunpack.c.1.s8 %v624_v30 }
 0x16f   : > { %2341 = vmatpush.bf16.msrb.mxu3 %v1824_v22  ;;  %v1209_v8 = vcvt.s32.f32 %v709_v31  ;;  %v779_v26 = vunpack.c.0.s8 %v579_v23  ;;  %v1734_v11 = vpack.c.bf16 %v1294_v12, %v1289_v20  ;;  %v1214_v18 = vcvt.s32.f32 %v714_v34 }
 0x170   : > { %v1853_v58 = vpack.c.bf16 %v1533_v5, %v1528_v2  ;;  %v784_v15 = vunpack.c.1.s8 %v579_v23  ;;  %v1459_v33 = vcvt.s32.f32 %v959_v28  ;;  %v1464_v14 = vcvt.s32.f32 %v964_v43  ;;  %v3609_v23 = vpop.f32.mrf.mxu3 }
 0x171   : > { %v1279_v0 = vcvt.s32.f32 %v779_v26  ;;  %v1018_v36 = vunpack.c.0.s8 %v638_v24  ;;  %2317 = vmatpush.bf16.msrb.mxu0 %v1734_v11  ;;  %v1694_v30 = vpack.c.bf16 %v1214_v18, %v1209_v8  ;;  %v1023_v13 = vunpack.c.1.s8 %v638_v24  ;;  %v3618_v18 = vpop.f32.mrf.mxu2 }
 0x172   : > { %2265 = vmatpush.bf16.msra.mxu1 %v1853_v58  ;;  %v1284_v40 = vcvt.s32.f32 %v784_v15  ;;  %v699_v1 = vunpack.c.0.s8 %v559_v3  ;;  %v1819_v45 = vpack.c.bf16 %v1464_v14, %v1459_v33  ;;  %v704_v37 = vunpack.c.1.s8 %v559_v3 }
 0x173   : > { %v1518_v41 = vcvt.s32.f32 %v1018_v36  ;;  %v949_v17 = vunpack.c.2.s8 %v619_v62  ;;  %2304 = vmatpush.bf16.msra.mxu2 %v1694_v30  ;;  %v1523_v35 = vcvt.s32.f32 %v1023_v13  ;;  %v954_v7 = vunpack.c.3.s8 %v619_v62  ;;  %v2051_v36 = vpop.f32.mrf.mxu1 }
 0x174   : > { %v1729_v54 = vpack.c.bf16 %v1284_v40, %v1279_v0  ;;  %v1199_v47 = vcvt.s32.f32 %v699_v1  ;;  %2342 = vmatpush.bf16.msrb.mxu3 %v1819_v45  ;;  %v1204_v24 = vcvt.s32.f32 %v704_v37  ;;  %v769_v49 = vunpack.c.2.s8 %v574_v4  ;;  %v614_v0 = vld [vmem:[%s2914_s22 + $0x200] sm:$0xff] }
 0x175   : > { %v1449_v9 = vcvt.s32.f32 %v949_v17  ;;  %v774_v3 = vunpack.c.3.s8 %v574_v4  ;;  %v1848_v51 = vpack.c.bf16 %v1523_v35, %v1518_v41  ;;  %v1454_v55 = vcvt.s32.f32 %v954_v7  ;;  %v609_v35 = vld [vmem:[%s2914_s22 + $0x1d8] sm:$0xff] }
 0x176   : > { %2318 = vmatpush.bf16.msrb.mxu0 %v1729_v54  ;;  %v1008_v29 = vunpack.c.2.s8 %v633_v57  ;;  %v1013_v60 = vunpack.c.3.s8 %v633_v57  ;;  %v1689_v42 = vpack.c.bf16 %v1204_v24, %v1199_v47  ;;  %v1269_v59 = vcvt.s32.f32 %v769_v49  ;;  %v649_v24 = vld [vmem:[%s2914_s22 + $0x318] sm:$0xff] }
 0x177   : > { %v1274_v63 = vcvt.s32.f32 %v774_v3  ;;  %v689_v22 = vunpack.c.2.s8 %v3612_v27  ;;  %2266 = vmatpush.bf16.msra.mxu1 %v1848_v51  ;;  %v1814_v20 = vpack.c.bf16 %v1454_v55, %v1449_v9  ;;  %v694_v2 = vunpack.c.3.s8 %v3612_v27 }
 0x178   : > { %v1508_v31 = vcvt.s32.f32 %v1008_v29  ;;  %v1513_v12 = vcvt.s32.f32 %v1013_v60  ;;  %2305 = vmatpush.bf16.msra.mxu2 %v1689_v42  ;;  %v939_v8 = vunpack.c.0.s8 %v619_v62  ;;  %v944_v28 = vunpack.c.1.s8 %v619_v62  ;;  %v2064_v30 = vpop.f32.mrf.mxu3 }
 0x179   : > { %v1724_v5 = vpack.c.bf16 %v1274_v63, %v1269_v59  ;;  %v1189_v34 = vcvt.s32.f32 %v689_v22  ;;  %2343 = vmatpush.bf16.msrb.mxu3 %v1814_v20  ;;  %v1194_v26 = vcvt.s32.f32 %v694_v2  ;;  %v1998_v11 = vadd.f32 %v3574_v21, %v3595_v19  ;;  %v669_v21 = vld [vmem:[%s2914_s22 + $0x3b8] sm:$0xff]  ;;  %v2090_v63 = vpop.f32.mrf.mxu2 }
 0x17a   : > { %v1843_v43 = vpack.c.bf16 %v1513_v12, %v1508_v31  ;;  %v759_v58 = vunpack.c.0.s8 %v574_v4  ;;  %v1439_v15 = vcvt.s32.f32 %v939_v8  ;;  %v1444_v44 = vcvt.s32.f32 %v944_v28 }
 0x17b   : > { %2319 = vmatpush.bf16.msrb.mxu0 %v1724_v5  ;;  %v764_v33 = vunpack.c.1.s8 %v574_v4  ;;  %v998_v14 = vunpack.c.0.s8 %v633_v57  ;;  %v1684_v62 = vpack.c.bf16 %v1194_v26, %v1189_v34  ;;  %v2011_v40 = vadd.f32 %v3564_v50, %v1998_v11 }
 0x17c   : > { %2267 = vmatpush.bf16.msra.mxu1 %v1843_v43  ;;  %v1259_v13 = vcvt.s32.f32 %v759_v58  ;;  %v1003_v1 = vunpack.c.1.s8 %v633_v57  ;;  %v1809_v19 = vpack.c.bf16 %v1444_v44, %v1439_v15  ;;  %v679_v37 = vunpack.c.0.s8 %v3612_v27  ;;  %v664_v15 = vld [vmem:[%s2914_s22 + $0x390] sm:$0xff] }
 0x17d   : > { %v1264_v45 = vcvt.s32.f32 %v764_v33  ;;  %v1498_v41 = vcvt.s32.f32 %v998_v14  ;;  %2306 = vmatpush.bf16.msra.mxu2 %v1684_v62  ;;  %v3625_v4 = vadd.f32 %v3576_v48, %v2011_v40  ;;  %v684_v39 = vunpack.c.1.s8 %v3612_v27  ;;  %v604_v40 = vld [vmem:[%s2914_s22 + $0x1b0] sm:$0xff] }
 0x17e   : > { %v1503_v17 = vcvt.s32.f32 %v1003_v1  ;;  %v929_v54 = vunpack.c.2.s8 %v614_v0  ;;  %2344 = vmatpush.bf16.msrb.mxu3 %v1809_v19  ;;  %v1179_v47 = vcvt.s32.f32 %v679_v37  ;;  %v934_v57 = vunpack.c.3.s8 %v614_v0 }
 0x17f   : > { %v1719_v50 = vpack.c.bf16 %v1264_v45, %v1259_v13  ;;  %v1149_v7 = vunpack.c.2.s8 %v669_v21  ;;  %v1184_v49 = vcvt.s32.f32 %v684_v39  ;;  %v1154_v52 = vunpack.c.3.s8 %v669_v21  ;;  %v644_v45 = vld [vmem:[%s2914_s22 + $0x2f0] sm:$0xff] }
 0x180   : > { %v1838_v9 = vpack.c.bf16 %v1503_v17, %v1498_v41  ;;  %v1429_v3 = vcvt.s32.f32 %v929_v54  ;;  %v1434_v51 = vcvt.s32.f32 %v934_v57  ;;  %v909_v48 = vunpack.c.2.s8 %v609_v35  ;;  %v3631_v28 = vpop.f32.mrf.mxu3 }
 0x181   : > { %2320 = vmatpush.bf16.msrb.mxu0 %v1719_v50  ;;  %v1649_v55 = vcvt.s32.f32 %v1149_v7  ;;  %v914_v29 = vunpack.c.3.s8 %v609_v35  ;;  %v1679_v60 = vpack.c.bf16 %v1184_v49, %v1179_v47  ;;  %v1654_v27 = vcvt.s32.f32 %v1154_v52 }
 0x182   : > { %2268 = vmatpush.bf16.msra.mxu1 %v1838_v9  ;;  %v1069_v42 = vunpack.c.2.s8 %v649_v24  ;;  %v1074_v59 = vunpack.c.3.s8 %v649_v24  ;;  %v1804_v22 = vpack.c.bf16 %v1434_v51, %v1429_v3  ;;  %v1409_v20 = vcvt.s32.f32 %v909_v48 }
 0x183   : > { %v1414_v31 = vcvt.s32.f32 %v914_v29  ;;  %v919_v12 = vunpack.c.0.s8 %v614_v0  ;;  %2307 = vmatpush.bf16.msra.mxu2 %v1679_v60  ;;  %v1914_v2 = vpack.c.bf16 %v1654_v27, %v1649_v55  ;;  %v924_v8 = vunpack.c.1.s8 %v614_v0 }
 0x184   : > { %v1569_v5 = vcvt.s32.f32 %v1069_v42  ;;  %v1574_v34 = vcvt.s32.f32 %v1074_v59  ;;  %2321 = vmatmul.bf16.vlgmr.msrb.gmra.mxu0 %v3769_v53  ;;  %2345 = vmatpush.bf16.msrb.mxu3 %v1804_v22  ;;  %v1139_v11 = vunpack.c.0.s8 %v669_v21  ;;  %v1144_v58 = vunpack.c.1.s8 %v669_v21  ;;  %v659_v42 = vld [vmem:[%s2914_s22 + $0x368] sm:$0xff] }
 0x185   : > { %v1794_v43 = vpack.c.bf16 %v1414_v31, %v1409_v20  ;;  %2269 = vmatmul.bf16.vlgmr.msra.gmra.mxu1 %v3330_v46  ;;  %v1419_v26 = vcvt.s32.f32 %v919_v12  ;;  %2365 = vmatpush.bf16.msra.mxu0 %v1914_v2  ;;  %v1424_v33 = vcvt.s32.f32 %v924_v8  ;;  %v899_v14 = vunpack.c.0.s8 %v609_v35  ;;  %v3638_v54 = vpop.f32.mrf.mxu0  ;;  %v3647_v12 = vld [vmem:[%s2914_s22 + $0x188] sm:$0xff] }
 0x186   : > { %v1874_v44 = vpack.c.bf16 %v1574_v34, %v1569_v5  ;;  %v904_v36 = vunpack.c.1.s8 %v609_v35  ;;  %2308 = vmatmul.bf16.vlgmr.msra.gmra.mxu2 %v3179_v61  ;;  %v1639_v53 = vcvt.s32.f32 %v1139_v11  ;;  %v1644_v0 = vcvt.s32.f32 %v1144_v58  ;;  %v639_v8 = vld [vmem:[%s2914_s22 + $0x2c8] sm:$0xff] }
 0x187   : > { %2326 = vmatpush.bf16.msrb.mxu1 %v1794_v43  ;;  %v1059_v30 = vunpack.c.0.s8 %v649_v24  ;;  %v1064_v62 = vunpack.c.1.s8 %v649_v24  ;;  %v1799_v13 = vpack.c.bf16 %v1424_v33, %v1419_v26  ;;  %v1399_v1 = vcvt.s32.f32 %v899_v14 }
 0x188   : > { %2352 = vmatpush.bf16.msrb.mxu2 %v1874_v44  ;;  %v1404_v19 = vcvt.s32.f32 %v904_v36  ;;  %v1129_v21 = vunpack.c.2.s8 %v664_v15  ;;  %v1909_v41 = vpack.c.bf16 %v1644_v0, %v1639_v53  ;;  %v1134_v39 = vunpack.c.3.s8 %v664_v15  ;;  %v2116_v55 = vpop.f32.mrf.mxu3 }
 0x189   : > { %v1559_v37 = vcvt.s32.f32 %v1059_v30  ;;  %v1564_v17 = vcvt.s32.f32 %v1064_v62  ;;  %2346 = vmatpush.bf16.msrb.mxu3 %v1799_v13  ;;  %v889_v50 = vunpack.c.2.s8 %v604_v40  ;;  %v894_v47 = vunpack.c.3.s8 %v604_v40 }
 0x18a   : > { %v1789_v35 = vpack.c.bf16 %v1404_v19, %v1399_v1  ;;  %v1629_v61 = vcvt.s32.f32 %v1129_v21  ;;  %2366 = vmatpush.bf16.msra.mxu0 %v1909_v41  ;;  %v1634_v7 = vcvt.s32.f32 %v1134_v39  ;;  %v1049_v24 = vunpack.c.2.s8 %v644_v45  ;;  %v3644_v59 = vpop.f32.mrf.mxu1  ;;  %v2404_v41 = vld [vmem:[#allocation1] sm:$0xff] }
 0x18b   : > { %v1869_v57 = vpack.c.bf16 %v1564_v17, %v1559_v37  ;;  %v1054_v9 = vunpack.c.3.s8 %v644_v45  ;;  %v1389_v49 = vcvt.s32.f32 %v889_v50  ;;  %v1394_v3 = vcvt.s32.f32 %v894_v47 }
 0x18c   : > { %2327 = vmatpush.bf16.msrb.mxu1 %v1789_v35  ;;  %v1119_v52 = vunpack.c.0.s8 %v664_v15  ;;  %v1124_v51 = vunpack.c.1.s8 %v664_v15  ;;  %2347 = vmatmul.bf16.vlgmr.msrb.gmra.mxu3 %v3233_v32  ;;  %v1904_v48 = vpack.c.bf16 %v1634_v7, %v1629_v61  ;;  %v1549_v29 = vcvt.s32.f32 %v1049_v24  ;;  %v654_v24 = vld [vmem:[%s2914_s22 + $0x340] sm:$0xff] }
 0x18d   : > { %2353 = vmatpush.bf16.msrb.mxu2 %v1869_v57  ;;  %v1554_v60 = vcvt.s32.f32 %v1054_v9  ;;  %v2050_v27 = vadd.f32 %v3607_v16, %v3591_v6  ;;  %v1784_v63 = vpack.c.bf16 %v1394_v3, %v1389_v49  ;;  %v879_v31 = vunpack.c.0.s8 %v604_v40  ;;  %v2129_v14 = vpop.f32.mrf.mxu0 }
 0x18e   : > { %v1619_v22 = vcvt.s32.f32 %v1119_v52  ;;  %v1624_v20 = vcvt.s32.f32 %v1124_v51  ;;  %2367 = vmatpush.bf16.msra.mxu0 %v1904_v48  ;;  %v884_v5 = vunpack.c.1.s8 %v604_v40  ;;  %v1039_v34 = vunpack.c.0.s8 %v644_v45 }
 0x18f   : > { %v1864_v2 = vpack.c.bf16 %v1554_v60, %v1549_v29  ;;  %v2063_v32 = vadd.f32 %v3609_v23, %v2050_v27  ;;  %v1379_v26 = vcvt.s32.f32 %v879_v31  ;;  %v1044_v6 = vunpack.c.1.s8 %v644_v45  ;;  %v594_v29 = vld [vmem:[%s2914_s22 + $0x160] sm:$0xff] }
 0x190   : > { %2328 = vmatpush.bf16.msrb.mxu1 %v1784_v63  ;;  %v1899_v43 = vpack.c.bf16 %v1624_v20, %v1619_v22  ;;  %v1109_v16 = vunpack.c.2.s8 %v659_v42  ;;  %v1384_v58 = vcvt.s32.f32 %v884_v5  ;;  %v1539_v15 = vcvt.s32.f32 %v1039_v34  ;;  %v634_v60 = vld [vmem:[%s2914_s22 + $0x2a0] sm:$0xff] }
 0x191   : > { %2354 = vmatpush.bf16.msrb.mxu2 %v1864_v2  ;;  %v1114_v44 = vunpack.c.3.s8 %v659_v42  ;;  %v869_v33 = vunpack.c.2.s8 %v3647_v12  ;;  %v1544_v36 = vcvt.s32.f32 %v1044_v6  ;;  %v874_v23 = vunpack.c.3.s8 %v3647_v12  ;;  %v3656_v37 = vpop.f32.mrf.mxu3 }
 0x192   : > { %v3651_v11 = vpop.f32.mrf.mxu2  ;;  %v1609_v53 = vcvt.s32.f32 %v1109_v16  ;;  %v1029_v0 = vunpack.c.2.s8 %v639_v8  ;;  %2368 = vmatpush.bf16.msra.mxu0 %v1899_v43  ;;  %v1779_v30 = vpack.c.bf16 %v1384_v58, %v1379_v26  ;;  %v1034_v13 = vunpack.c.3.s8 %v639_v8  ;;  %v2103_v50 = vpop.f32.mrf.mxu1 }
 0x193   : > { %v1614_v62 = vcvt.s32.f32 %v1114_v44  ;;  %v1369_v40 = vcvt.s32.f32 %v869_v33  ;;  %v1859_v1 = vpack.c.bf16 %v1544_v36, %v1539_v15  ;;  %v1374_v19 = vcvt.s32.f32 %v874_v23 }
 0x194   : > { %v1529_v21 = vcvt.s32.f32 %v1029_v0  ;;  %v2076_v45 = vadd.f32 %v3599_v25, %v2063_v32  ;;  %2329 = vmatpush.bf16.msrb.mxu1 %v1779_v30  ;;  %v1534_v39 = vcvt.s32.f32 %v1034_v13  ;;  %v1099_v35 = vunpack.c.0.s8 %v659_v42  ;;  %v344_v25 = vld [vmem:[%s3735_s1] sm:$0x3]  ;;  %v674_v30 = vld [vmem:[%s2914_s22 + $0x3e0] sm:$0xff] }
 0x195   : > { %v1894_v17 = vpack.c.bf16 %v1614_v62, %v1609_v53  ;;  %v1104_v61 = vunpack.c.1.s8 %v659_v42  ;;  %2355 = vmatpush.bf16.msrb.mxu2 %v1859_v1  ;;  %v1774_v47 = vpack.c.bf16 %v1374_v19, %v1369_v40  ;;  %v859_v7 = vunpack.c.0.s8 %v3647_v12  ;;  %v2407_v19 = vld [vmem:[#allocation1 + $0x1b] sm:$0xff] }
 0x196   : > { %v3659_v57 = vadd.f32 %v3618_v18, %v2076_v45  ;;  %v1854_v9 = vpack.c.bf16 %v1534_v39, %v1529_v21  ;;  %v1599_v49 = vcvt.s32.f32 %v1099_v35  ;;  %v2414_v52 = vsel %vm2413_vm3, %v2404_v41, 0 }
 0x197   : > { %2369 = vmatpush.bf16.msra.mxu0 %v1894_v17  ;;  %v1604_v3 = vcvt.s32.f32 %v1104_v61  ;;  %2431 = vmatpush.bf16.msra.mxu3 %v2414_v52  ;;  %v864_v51 = vunpack.c.1.s8 %v3647_v12  ;;  %v1359_v18 = vcvt.s32.f32 %v859_v7  ;;  %v1019_v55 = vunpack.c.0.s8 %v639_v8 }
 0x198   : > { %v1024_v48 = vunpack.c.1.s8 %v639_v8  ;;  %2330 = vmatpush.bf16.msrb.mxu1 %v1774_v47  ;;  %v3670_v63 = vpack.c.bf16 %v344_v25, %v344_v25  ;;  %v1089_v22 = vunpack.c.2.s8 %v654_v24  ;;  %v1094_v32 = vunpack.c.3.s8 %v654_v24 }
 0x199   : > { %v1889_v42 = vpack.c.bf16 %v1604_v3, %v1599_v49  ;;  %2356 = vmatpush.bf16.msrb.mxu2 %v1854_v9  ;;  %v1364_v20 = vcvt.s32.f32 %v864_v51  ;;  %v1519_v31 = vcvt.s32.f32 %v1019_v55  ;;  %v849_v12 = vunpack.c.2.s8 %v594_v29  ;;  %v2155_v58 = vpop.f32.mrf.mxu3  ;;  %v2406_v9 = vld [vmem:[#allocation1 + $0x12] sm:$0xff] }
 0x19a   : > { %v2142_v27 = vpop.f32.mrf.mxu2  ;;  %v1524_v2 = vcvt.s32.f32 %v1024_v48  ;;  %v1589_v5 = vcvt.s32.f32 %v1089_v22  ;;  %v854_v34 = vunpack.c.3.s8 %v594_v29  ;;  %v1009_v43 = vunpack.c.2.s8 %v634_v60 }
 0x19b   : > { %2370 = vmatpush.bf16.msra.mxu0 %v1889_v42  ;;  %v1769_v8 = vpack.c.bf16 %v1364_v20, %v1359_v18  ;;  %v1594_v6 = vcvt.s32.f32 %v1094_v32  ;;  %v1014_v16 = vunpack.c.3.s8 %v634_v60  ;;  %v1349_v15 = vcvt.s32.f32 %v849_v12  ;;  %v2408_v18 = vld [vmem:[#allocation1 + $0x24] sm:$0xff] }
 0x19c   : > { %v1849_v26 = vpack.c.bf16 %v1524_v2, %v1519_v31  ;;  %2674 = vmatmul.msk.bf16.vlgmr.msra.gmra.mxu3 %vm2409_vm4, %v3670_v63  ;;  %v1354_v44 = vcvt.s32.f32 %v854_v34  ;;  %v1509_v33 = vcvt.s32.f32 %v1009_v43  ;;  %v1079_v14 = vunpack.c.0.s8 %v654_v24  ;;  %v2405_v2 = vld [vmem:[#allocation1 + $0x9] sm:$0xff] }
 0x19d   : > { %2331 = vmatpush.bf16.msrb.mxu1 %v1769_v8  ;;  %v1884_v36 = vpack.c.bf16 %v1594_v6, %v1589_v5  ;;  %v1514_v53 = vcvt.s32.f32 %v1014_v16  ;;  %v1084_v23 = vunpack.c.1.s8 %v654_v24  ;;  %v839_v0 = vunpack.c.0.s8 %v594_v29 }
 0x19e   : > { %2357 = vmatpush.bf16.msrb.mxu2 %v1849_v26  ;;  %v1764_v62 = vpack.c.bf16 %v1354_v44, %v1349_v15  ;;  %v1579_v40 = vcvt.s32.f32 %v1079_v14  ;;  %v844_v13 = vunpack.c.1.s8 %v594_v29  ;;  %v999_v1 = vunpack.c.0.s8 %v634_v60 }
 0x19f   : > { %2371 = vmatpush.bf16.msra.mxu0 %v1884_v36  ;;  %v1844_v21 = vpack.c.bf16 %v1514_v53, %v1509_v33  ;;  %v1584_v45 = vcvt.s32.f32 %v1084_v23  ;;  %v1339_v41 = vcvt.s32.f32 %v839_v0  ;;  %v1004_v17 = vunpack.c.1.s8 %v634_v60 }
 0x1a0   : > { %v1344_v39 = vcvt.s32.f32 %v844_v13  ;;  %v1499_v35 = vcvt.s32.f32 %v999_v1  ;;  %v1169_v61 = vunpack.c.2.s8 %v674_v30  ;;  %v1174_v50 = vunpack.c.3.s8 %v674_v30 }
 0x1a1   : > { %2332 = vmatpush.bf16.msrb.mxu1 %v1764_v62  ;;  %v1879_v47 = vpack.c.bf16 %v1584_v45, %v1579_v40  ;;  %v1504_v7 = vcvt.s32.f32 %v1004_v17  ;;  %v2420_v25 = vsel %vm2413_vm3, %v2407_v19, 0  ;;  %v1159_v24 = vunpack.c.0.s8 %v674_v30  ;;  %v2205_v60 = vpop.f32.mrf.mxu3 }
 0x1a2   : > { %2358 = vmatpush.bf16.msrb.mxu2 %v1844_v21  ;;  %v1759_v49 = vpack.c.bf16 %v1344_v39, %v1339_v41  ;;  %v1669_v3 = vcvt.s32.f32 %v1169_v61  ;;  %v1674_v52 = vcvt.s32.f32 %v1174_v50  ;;  %2470 = vmatpush.bf16.msrb.mxu3 %v2420_v25  ;;  %v1164_v51 = vunpack.c.1.s8 %v674_v30 }
 0x1a3   : > { %2372 = vmatpush.bf16.msra.mxu0 %v1879_v47  ;;  %v1839_v55 = vpack.c.bf16 %v1504_v7, %v1499_v35  ;;  %v1659_v48 = vcvt.s32.f32 %v1159_v24  ;;  %v2102_v29 = vadd.f32 %v3644_v59, %v3659_v57  ;;  %v2418_v22 = vsel %vm2413_vm3, %v2406_v9, 0 }
 0x1a4   : > { %v1924_v27 = vpack.c.bf16 %v1674_v52, %v1669_v3  ;;  %v1664_v42 = vcvt.s32.f32 %v1164_v51  ;;  %v2141_v20 = vadd.f32 %v3651_v11, %v3638_v54  ;;  %v2422_v32 = vsel %vm2413_vm3, %v2408_v18, 0 }
 0x1a5   : > { %2333 = vmatpush.bf16.msrb.mxu1 %v1759_v49  ;;  %v3682_v31 = vadd.f32 %v3631_v28, %v2102_v29  ;;  %v2416_v54 = vsel %vm2413_vm3, %v2405_v2, 0 }
 0x1a6   : > { %2359 = vmatpush.bf16.msrb.mxu2 %v1839_v55  ;;  %2373 = vmatmul.bf16.vlgmr.msra.gmra.mxu0 %v3332_v38  ;;  %v1919_v59 = vpack.c.bf16 %v1664_v42, %v1659_v48  ;;  %v2154_v57 = vadd.f32 %v3656_v37, %v2141_v20  ;;  %v2738_v20 = vld [vmem:[%s3019_s13 + $0x10] sm:$0x1f] }
 0x1a7   : > { %2483 = vmatpush.bf16.msrb.mxu0 %v2422_v32  ;;  %v2393_v2 = vperm.slane %v2738_v20, 3 }
 0x1a8   : > { %2334 = vmatmul.bf16.vlgmr.msrb.gmra.mxu1 %v3231_v56 }
 0x1a9   : > { %2384 = vmatpush.bf16.msra.mxu1 %v1924_v27  ;;  %2360 = vmatmul.bf16.vlgmr.msrb.gmra.mxu2 %v3330_v46  ;;  %v2179_v11 = vpop.f32.mrf.mxu0  ;;  %v2207_v28 = vpop.f32.mrf.mxu3  ;;  %v3701_v27 = vld [vmem:[%s3019_s13] sm:$0x1f] }
 0x1aa   : > { %2457 = vmatpush.bf16.msra.mxu2 %v2418_v22  ;;  %v2391_v42 = vperm.slane %v3701_v27, 3 }
 0x1ac   : > { %2677 = vmatmul.msk.bf16.vlgmr.msrb.gmra.mxu3 %vm2409_vm4, %v3670_v63 }
 0x1ad   : > { %2385 = vmatpush.bf16.msra.mxu1 %v1919_v59 }
 0x1b0   : > { %v2166_v5 = vpop.f32.mrf.mxu1 }
 0x1b1   : > { %2444 = vmatpush.bf16.msrb.mxu1 %v2416_v54  ;;  %v2181_v38 = vpop.f32.mrf.mxu0  ;;  %v2167_v12 = vadd.f32 %v2166_v5, %v2154_v57  ;;  %v2396_v57 = vmul.f32 %v2391_v42, %v3625_v4  ;;  %v2739_v54 = vld [vmem:[%s3019_s13 + $0x18] sm:$0x1f] }
 0x1b2   : > { %v2740_v38 = vld [vmem:[%s3019_s13 + $0x20] sm:$0x1f] }
 0x1b3   : > { %v2180_v34 = vadd.f32 %v2179_v11, %v2167_v12  ;;  %v2394_v11 = vperm.slane %v2739_v54, 3  ;;  %v2395_v5 = vperm.slane %v2740_v38, 3 }
 0x1b6   : > { %2678 = vmatmul.msk.bf16.vlgmr.msrb.gmra.mxu0 %vm2409_vm4, %v3670_v63 }
 0x1b7   : > { %v2192_v37 = vpop.f32.mrf.mxu2 }
 0x1b8   : > { %2673 = vmatmul.msk.bf16.vlgmr.msra.gmra.mxu1 %vm1932_vm2, %v3395_v10  ;;  %v2193_v56 = vadd.f32 %v2192_v37, %v2180_v34  ;;  %v2168_v46 = vpop.f32.mrf.mxu1  ;;  %v2494_v37 = vperm.slane %v3701_v27, 1 }
 0x1b9   : > { %2676 = vmatmul.msk.bf16.vlgmr.msra.gmra.mxu2 %vm2409_vm4, %v3670_v63  ;;  %v2741_v46 = vld [vmem:[%s3019_s13 + $0x8] sm:$0x1f] }
 0x1ba   : > { %v2206_v43 = vadd.f32 %v2205_v60, %v2193_v56 }
 0x1bc   : > { %v2398_v56 = vmul.f32 %v2393_v2, %v2206_v43  ;;  %v2509_v43 = vperm.slane %v3701_v27, 2 }
 0x1be   : > { %v2231_v8 = vpop.f32.mrf.mxu3 }
 0x1bf   : > { %v2194_v26 = vpop.f32.mrf.mxu2 }
 0x1c6   : > { %v2233_v6 = vpop.f32.mrf.mxu3 }
 0x1c8   : > { %2675 = vmatmul.msk.bf16.vlgmr.msrb.gmra.mxu1 %vm2409_vm4, %v3670_v63 }
 0x1d1   : > { %v2244_v16 = vpop.f32.mrf.mxu0 }
 0x1d8   : > { %v2218_v58 = vpop.f32.mrf.mxu1 }
 0x1d9   : > { %v2246_v15 = vpop.f32.mrf.mxu0  ;;  %v2232_v44 = vadd.f32 %v2231_v8, %v2218_v58  ;;  %v2392_v8 = vperm.slane %v2741_v46, 3  ;;  %v2496_v58 = vperm.slane %v2738_v20, 1 }
 0x1db   : > { %v2245_v33 = vadd.f32 %v2244_v16, %v2232_v44  ;;  %v2397_v4 = vmul.f32 %v2392_v8, %v3682_v31  ;;  %v2512_v31 = vperm.slane %v2739_v54, 2 }
 0x1df   : > { %v2257_v14 = vpop.f32.mrf.mxu2 }
 0x1e0   : > { %v2258_v36 = vadd.f32 %v2257_v14, %v2245_v33  ;;  %v2220_v10 = vpop.f32.mrf.mxu1  ;;  %v2497_v33 = vperm.slane %v2739_v54, 1 }
 0x1e1   : > { %v2296_v53 = vpop.f32.mrf.mxu0  ;;  %v2498_v10 = vperm.slane %v2740_v38, 1 }
 0x1e6   : > { %v2283_v23 = vpop.f32.mrf.mxu3 }
 0x1e7   : > { %v2259_v0 = vpop.f32.mrf.mxu2 }
 0x1e9   : > { %v2298_v30 = vpop.f32.mrf.mxu0 }
 0x1ee   : > { %v2285_v62 = vpop.f32.mrf.mxu3 }
 0x201   : > { %v2322_v40 = vpop.f32.mrf.mxu0 }
 0x202   : > { %v2270_v13 = vpop.f32.mrf.mxu1 }
 0x203   : > { %v2271_v1 = vadd.f32 %v2270_v13, %v2258_v36  ;;  %v2511_v13 = vperm.slane %v2738_v20, 2 }
 0x205   : > { %v2284_v19 = vadd.f32 %v2283_v23, %v2271_v1  ;;  %v2495_v23 = vperm.slane %v2741_v46, 1 }
 0x207   : > { %v2297_v45 = vadd.f32 %v2296_v53, %v2284_v19 }
 0x209   : > { %v2324_v21 = vpop.f32.mrf.mxu0  ;;  %v2309_v63 = vpop.f32.mrf.mxu2  ;;  %v2399_v26 = vmul.f32 %v2394_v11, %v2297_v45  ;;  %v2510_v45 = vperm.slane %v2741_v46, 2 }
 0x20a   : > { %v2272_v41 = vpop.f32.mrf.mxu1  ;;  %v2323_v49 = vadd.f32 %v2322_v40, %v2309_v63 }
 0x20f   : > { %v2348_v17 = vpop.f32.mrf.mxu3 }
 0x211   : > { %v2311_v39 = vpop.f32.mrf.mxu2 }
 0x217   : > { %v2350_v35 = vpop.f32.mrf.mxu3 }
 0x21f   : > { %v2433_v61 = vpop.f32.mrf.mxu3 }
 0x220   : > { %v2489_v34 = vadd.f32 %v2433_v61, %v2396_v57 }
 0x222   : > { %v2499_v15 = vadd.f32 %v2494_v37, %v2489_v34 }
 0x223   : > { %v2374_v50 = vpop.f32.mrf.mxu0 }
 0x224   : > { %v2504_v30 = vmax.f32 %v2499_v15, 0.0 }
 0x225   : > { %v2335_v47 = vpop.f32.mrf.mxu1 }
 0x226   : > { %v2336_v52 = vadd.f32 %v2335_v47, %v2323_v49  ;;  %v2514_v63 = vmul.f32 %v2509_v43, %v2504_v30 }
 0x227   : > { %v2435_v7 = vpop.f32.mrf.mxu3 }
 0x228   : > { %v2349_v55 = vadd.f32 %v2348_v17, %v2336_v52 }
 0x22b   : > { %v2376_v24 = vpop.f32.mrf.mxu0 }
 0x22c   : > { %v2361_v25 = vpop.f32.mrf.mxu2 }
 0x22d   : > { %v2337_v9 = vpop.f32.mrf.mxu1  ;;  %v2362_v29 = vadd.f32 %v2361_v25, %v2349_v55  ;;  %v2520_v25 = vsel %vm2519_vm5, %v2514_v63, 0.0 }
 0x22f   : > { %v2472_v3 = vpop.f32.mrf.mxu3  ;;  %v2375_v22 = vadd.f32 %v2374_v50, %v2362_v29  ;;  %v2513_v50 = vperm.slane %v2740_v38, 2  ;;  %v2532_v29 = vperm.slane %v3701_v27, 4 }
 0x230   : > { %v2492_v44 = vadd.f32 %v2472_v3, %v2399_v26 }
 0x232   : > { %v2502_v62 = vadd.f32 %v2497_v33, %v2492_v44 }
 0x233   : > { %v2485_v18 = vpop.f32.mrf.mxu0 }
 0x234   : > { %v2363_v51 = vpop.f32.mrf.mxu2  ;;  %v2507_v41 = vmax.f32 %v2502_v62, 0.0 }
 0x235   : > { %v2387_v48 = vpop.f32.mrf.mxu1 }
 0x236   : > { %v2388_v28 = vadd.f32 %v2387_v48, %v2375_v22  ;;  %v2517_v7 = vmul.f32 %v2512_v31, %v2507_v41 }
 0x237   : > { %v2474_v60 = vpop.f32.mrf.mxu3 }
 0x238   : > { %v2400_v6 = vmul.f32 %v2395_v5, %v2388_v28  ;;  %v2525_v51 = vsel %vm2519_vm5, %v2517_v7, 0.0 }
 0x23a   : > { %v2493_v36 = vadd.f32 %v2485_v18, %v2400_v6 }
 0x23b   : > { %v2487_v59 = vpop.f32.mrf.mxu0 }
 0x23c   : > { %v2459_v32 = vpop.f32.mrf.mxu2  ;;  %v2503_v1 = vadd.f32 %v2498_v10, %v2493_v36 }
 0x23d   : > { %v2389_v12 = vpop.f32.mrf.mxu1  ;;  %v2491_v16 = vadd.f32 %v2459_v32, %v2398_v56 }
 0x23e   : > { %v2508_v39 = vmax.f32 %v2503_v1, 0.0 }
 0x23f   : > { %v2501_v53 = vadd.f32 %v2496_v58, %v2491_v16 }
 0x240   : > { %v2518_v49 = vmul.f32 %v2513_v50, %v2508_v39 }
 0x241   : > { %v2506_v19 = vmax.f32 %v2501_v53, 0.0 }
 0x242   : > { %v2528_v55 = vsel %vm2527_vm6, %v2518_v49, 0.0 }
 0x243   : > { %v2516_v35 = vmul.f32 %v2511_v13, %v2506_v19 }
 0x244   : > { %v2461_v14 = vpop.f32.mrf.mxu2 }
 0x245   : > { %v2446_v0 = vpop.f32.mrf.mxu1  ;;  %v2523_v3 = vsel %vm2519_vm5, %v2516_v35, 0.0 }
 0x246   : > { %v2490_v40 = vadd.f32 %v2446_v0, %v2397_v4 }
 0x248   : > { %v2500_v21 = vadd.f32 %v2495_v23, %v2490_v40 }
 0x24a   : > { %v2505_v17 = vmax.f32 %v2500_v21, 0.0 }
 0x24c   : > { %v2515_v61 = vmul.f32 %v2510_v45, %v2505_v17 }
 0x24d   : > { %v2448_v47 = vpop.f32.mrf.mxu1 }
 0x24e   : > { %v2521_v24 = vsel %vm2519_vm5, %v2515_v61, 0.0 }
 0x24f   : > { %v2522_v9 = vadd.f32 %v2521_v24, %v2520_v25 }
 0x251   : > { %v2524_v52 = vadd.f32 %v2523_v3, %v2522_v9 }
 0x253   : > { %v2526_v18 = vadd.f32 %v2525_v51, %v2524_v52 }
 0x255   : > { %v2529_v48 = vadd.f32 %v2528_v55, %v2526_v18 }
 0x257   : > { %2530 = vadd.xlane.f32.xlu0 %v2529_v48 }
 0x2c7   : > { %2537 = sbr.rel (%p2679_p7) target bundleno = 718 (0x2ce), region = 52 }
 0x2ca   : > { %v2531_v60 = vpop.xlane.xlu0 %2530 }
 0x2cb   : > { %v2533_v42 = vadd.f32 %v2532_v29, %v2531_v60 }
 0x2cc   : > { %vm2538_vm7 = vcmask 1024  }
 0x2cd   : > { %2539 = vst.msk [vmem:[%s3740_s6] sm:$0x3] %vm2538_vm7, %v2533_v42 }
 0x2ce PF: > { %p2680_p8 = scmp.ne.s32.totalorder %s2869_s28, 1 }
 0x2d0   : > { %2543 = sbr.rel (%p2680_p8) target bundleno = 727 (0x2d7), region = 56 }
 0x2d5   : > { %vm2544_vm8 = vcmask 1024  }
 0x2d6   : > { %2545 = vst.msk [vmem:[%s3741_s7] sm:$0x3] %vm2544_vm8, %v2533_v42 }
 0x2d7 PF: > { %p18_p9 = scmp.ge.s32.totalorder %s2872_s29, 4   ;;  %s3770_s24 = smov %s2798_s25 }
 0x2d8   : > { %s3771_s25 = smov %s2802_s26  ;;  %s3772_s26 = smov %s2882_s9 }
 0x2d9   : > { %s3773_s27 = smov %s2872_s29  ;;  %20 = sbr.rel (!%p18_p9) target bundleno = 3 (0x3), region = 105 }
 0x2de   :  { %2563 = vsyncpa [#allocation3], 1 }
 0x2df   :  { %2565 = vsyncpa [#allocation3 + $0x1], 1 }

</bundles_post_ra>
